<compile_context>
chip_gen: v7x
topology: tpu7x:2x2x1
jax: 0.10.0
libtpu: 0.0.40
codegen_flags: <defaults>
</compile_context>

<pallas_src>
import jax
import jax.numpy as jnp
import numpy as np
from jax.experimental import pallas as pl
from jax.experimental.pallas import tpu as pltpu


def _make_kernel(H, W, Cin, Cmid, Cout, has_downsample):
    """Fused bottleneck kernel body (one batch element per grid step)."""

    def kernel(x_ref, w1d_ref, b1_ref, w2_ref, b2_ref, w3_ref, b3_ref, *rest):
        if has_downsample:
            bd_ref, o_ref = rest
        else:
            (o_ref,) = rest

        x2d = x_ref[0].reshape(H * W, Cin)                    # bf16 (H*W, Cin)

        # ---- conv1 (1x1) [+ downsample 1x1, fused into one matmul] ---------
        h = jnp.dot(x2d, w1d_ref[...], preferred_element_type=jnp.float32)
        h1 = jnp.maximum(h[:, :Cmid] + b1_ref[...], 0.0)      # (H*W, Cmid) f32
        if has_downsample:
            idn = h[:, Cmid:] + bd_ref[...]                   # (H*W, Cout) f32
        else:
            idn = x2d.astype(jnp.float32)                     # Cin == Cout

        # ---- conv2 (3x3, pad=1, stride=1): im2col + one K=9*Cmid matmul ----
        # shifted[y, x] = h1[y + ky - 1, x + kx - 1] with zero padding,
        # built from cheap value-level slices/concat (no padded VMEM scratch,
        # no masked ref stores, no per-step zero fill).
        h1_3d = h1.reshape(H, W, Cmid)
        zrow = jnp.zeros((1, W, Cmid), jnp.float32)
        zcol = jnp.zeros((H, 1, Cmid), jnp.float32)
        rows = (
            jnp.concatenate([zrow, h1_3d[:H - 1]], axis=0),   # ky = 0 (y - 1)
            h1_3d,                                            # ky = 1 (y)
            jnp.concatenate([h1_3d[1:], zrow], axis=0),       # ky = 2 (y + 1)
        )
        taps = []
        for v in rows:                                        # ky = 0, 1, 2
            taps.append(jnp.concatenate([zcol, v[:, :W - 1]], axis=1))  # kx=0
            taps.append(v)                                                # kx=1
            taps.append(jnp.concatenate([v[:, 1:], zcol], axis=1))       # kx=2
        cols = jnp.concatenate(taps, axis=-1).reshape(H * W, 9 * Cmid)
        h2 = jnp.dot(cols.astype(jnp.bfloat16), w2_ref[...],
                     preferred_element_type=jnp.float32)
        h2 = jnp.maximum(h2 + b2_ref[...], 0.0)               # (H*W, Cmid) f32

        # ---- conv3 (1x1) + bn3 ---------------------------------------------
        h3 = jnp.dot(h2.astype(jnp.bfloat16), w3_ref[...],
                     preferred_element_type=jnp.float32) + b3_ref[...]

        # ---- residual add + relu -------------------------------------------
        out = jnp.maximum(h3 + idn, 0.0)                      # (H*W, Cout)
        o_ref[...] = out.reshape(1, H, W, Cout)

    return kernel


def bottleneck_pallas_nhwc(x_nhwc, params, *, stride=1):
    """Fused bottleneck block, NHWC in / NHWC out."""
    assert stride == 1, "TODO(synk): stride > 1 not implemented"
    w1d, b1, w2, b2, w3, b3, bd = params
    N, H, W, Cin = x_nhwc.shape
    Cmid = b1.shape[-1]
    Cout = b3.shape[-1]
    has_downsample = bd is not None
    if not has_downsample:
        assert Cin == Cout, "identity path requires Cin == Cout without downsample"

    x_bf16 = x_nhwc.astype(jnp.bfloat16)
    kernel = _make_kernel(H, W, Cin, Cmid, Cout, has_downsample)

    full2 = lambda n: (0, 0)
    in_specs = [
        pl.BlockSpec((1, H, W, Cin), lambda n: (n, 0, 0, 0)),
        pl.BlockSpec(w1d.shape, full2),
        pl.BlockSpec(b1.shape, full2),
        pl.BlockSpec(w2.shape, full2),
        pl.BlockSpec(b2.shape, full2),
        pl.BlockSpec(w3.shape, full2),
        pl.BlockSpec(b3.shape, full2),
    ]
    args = [x_bf16, w1d, b1, w2, b2, w3, b3]
    if has_downsample:
        in_specs.append(pl.BlockSpec(bd.shape, full2))
        args.append(bd)

    return pl.pallas_call(
        kernel,
        out_shape=jax.ShapeDtypeStruct((N, H, W, Cout), jnp.float32),
        grid_spec=pltpu.PrefetchScalarGridSpec(
            num_scalar_prefetch=0,
            grid=(N,),
            in_specs=in_specs,
            out_specs=pl.BlockSpec((1, H, W, Cout), lambda n: (n, 0, 0, 0)),
        ),
        compiler_params=pltpu.CompilerParams(
            dimension_semantics=("parallel",),
            vmem_limit_bytes=48 * 1024 * 1024),
    )(*args)


def bottleneck_pallas(x_nchw, params, *, stride=1):
    """NCHW compatibility shim (matches the PyTorch module's layout)."""
    x_nhwc = jnp.transpose(x_nchw, (0, 2, 3, 1))
    out_nhwc = bottleneck_pallas_nhwc(x_nhwc, params, stride=stride)
    return jnp.transpose(out_nhwc, (0, 3, 1, 2))


# ---------------------------------------------------------------------------
# Deterministic parameter construction (matches the nn.Module shapes).
# BN scale is folded into the conv weights on the host; conv1 and the
# downsample 1x1 weights are concatenated for the fused first matmul.
# ---------------------------------------------------------------------------
def make_params(key, in_channels, out_channels, expansion=4, stride=1):
    assert stride == 1, "TODO(synk): stride > 1 not implemented"
    mid = out_channels // expansion
    ks = jax.random.split(key, 4)
    eps = 1e-5

    def bn_affine(c):
        gamma = 1.0 + 0.1 * jnp.arange(c, dtype=jnp.float32)
        beta = 0.05 * jnp.arange(c, dtype=jnp.float32)
        rmean = 0.01 * jnp.arange(c, dtype=jnp.float32)
        rvar = 1.0 + 0.02 * jnp.arange(c, dtype=jnp.float32)
        scale = gamma / jnp.sqrt(rvar + eps)
        bias = beta - rmean * scale
        return scale, bias.reshape(1, c)

    # PyTorch conv weights are OIHW
    w1_oihw = 0.1 * jax.random.normal(ks[0], (mid, in_channels, 1, 1), jnp.float32)
    w2_oihw = 0.1 * jax.random.normal(ks[1], (mid, mid, 3, 3), jnp.float32)
    w3_oihw = 0.1 * jax.random.normal(ks[2], (out_channels, mid, 1, 1), jnp.float32)
    wd_oihw = 0.1 * jax.random.normal(ks[3], (out_channels, in_channels, 1, 1), jnp.float32)

    s1, b1 = bn_affine(mid)
    s2, b2 = bn_affine(mid)
    s3, b3 = bn_affine(out_channels)
    sd, bd = bn_affine(out_channels)

    # Fold BN scale into the conv output channels; repack channel-last.
    w1 = (w1_oihw[:, :, 0, 0] * s1[:, None]).T                 # (Cin, Cmid)
    w3 = (w3_oihw[:, :, 0, 0] * s3[:, None]).T                 # (Cmid, Cout)
    wd = (wd_oihw[:, :, 0, 0] * sd[:, None]).T                 # (Cin, Cout)
    w2 = jnp.concatenate(                                      # (9*Cmid, Cmid)
        [(w2_oihw[:, :, ky, kx] * s2[:, None]).T
         for ky in range(3) for kx in range(3)], axis=0)

    has_downsample = (in_channels != out_channels) or (stride != 1)
    if has_downsample:
        w1d = jnp.concatenate([w1, wd], axis=1)                # (Cin, Cmid+Cout)
        bd_k = bd
    else:
        w1d = w1
        bd_k = None

    kernel_params = (w1d.astype(jnp.bfloat16), b1,
                     w2.astype(jnp.bfloat16), b2,
                     w3.astype(jnp.bfloat16), b3, bd_k)
    torch_style = (w1_oihw, w2_oihw, w3_oihw,
                   wd_oihw if has_downsample else None,
                   (s1, b1), (s2, b2), (s3, b3), (sd, bd))
    return kernel_params, torch_style


# ---------------------------------------------------------------------------
# Pure-JAX reference (lax.conv, f32) for verification
# ---------------------------------------------------------------------------
def reference_bottleneck(x_nchw, torch_style):
    w1, w2, w3, wd, bn1, bn2, bn3, bnd = torch_style

    def conv(x, w_oihw, pad):
        w_hwio = jnp.transpose(w_oihw, (2, 3, 1, 0))
        return jax.lax.conv_general_dilated(
            x, w_hwio, (1, 1), ((pad, pad), (pad, pad)),
            dimension_numbers=('NHWC', 'HWIO', 'NHWC'),
            precision=jax.lax.Precision.HIGHEST)

    def bn(x, sb):
        s, b = sb
        return x * s.reshape(1, 1, 1, -1) + b.reshape(1, 1, 1, -1)

    x = jnp.transpose(x_nchw, (0, 2, 3, 1))
    out = jax.nn.relu(bn(conv(x, w1, 0), bn1))
    out = jax.nn.relu(bn(conv(out, w2, 1), bn2))
    out = bn(conv(out, w3, 0), bn3)
    identity = bn(conv(x, wd, 0), bnd) if wd is not None else x
    out = jax.nn.relu(out + identity)
    return jnp.transpose(out, (0, 3, 1, 2))


if __name__ == "__main__":
    N, Cin, H, W = 2, 4, 16, 16
    Cout, expansion = 8, 4        # mid channels = 2; in != out -> downsample path

    key = jax.random.PRNGKey(0)
    kx, kp = jax.random.split(key)
    x = jax.random.normal(kx, (N, Cin, H, W), jnp.float32)

    kernel_params, torch_style = make_params(kp, Cin, Cout, expansion)

    out = bottleneck_pallas(x, kernel_params, stride=1)
    out = jax.block_until_ready(out)

    ref = jax.block_until_ready(reference_bottleneck(x, torch_style))
    # bf16 matmul operands (f32 accumulation) -> loosened tolerances.
    np.testing.assert_allclose(np.asarray(out), np.asarray(ref),
                               rtol=2e-2, atol=2e-2)
    print("KERNEL_OK")
</pallas_src>

<mosaic_0001>
module attributes {stable_mosaic.version = 11 : i64} {
  func.func @kernel(%arg0: i32, %arg1: memref<1x16x16x4xbf16, #tpu.memory_space<vmem>>, %arg2: memref<4x10xbf16, #tpu.memory_space<vmem>>, %arg3: memref<1x2xf32, #tpu.memory_space<vmem>>, %arg4: memref<18x2xbf16, #tpu.memory_space<vmem>>, %arg5: memref<1x2xf32, #tpu.memory_space<vmem>>, %arg6: memref<2x8xbf16, #tpu.memory_space<vmem>>, %arg7: memref<1x8xf32, #tpu.memory_space<vmem>>, %arg8: memref<1x8xf32, #tpu.memory_space<vmem>>, %arg9: memref<1x16x16x8xf32, #tpu.memory_space<vmem>>) attributes {dimension_semantics = [#tpu.dimension_semantics<parallel>], iteration_bounds = array<i64: 2>, scalar_prefetch = 0 : i64, scratch_operands = 0 : i64, tpu.core_type = #tpu.core_type<tc>, window_params = [{transform_indices = @transform_0, window_bounds = array<i64: 1, 16, 16, 4>}, {pipeline_mode = #tpu.pipeline_mode<synchronous>, transform_indices = @transform_1, window_bounds = array<i64: 4, 10>}, {pipeline_mode = #tpu.pipeline_mode<synchronous>, transform_indices = @transform_2, window_bounds = array<i64: 1, 2>}, {pipeline_mode = #tpu.pipeline_mode<synchronous>, transform_indices = @transform_3, window_bounds = array<i64: 18, 2>}, {pipeline_mode = #tpu.pipeline_mode<synchronous>, transform_indices = @transform_4, window_bounds = array<i64: 1, 2>}, {pipeline_mode = #tpu.pipeline_mode<synchronous>, transform_indices = @transform_5, window_bounds = array<i64: 2, 8>}, {pipeline_mode = #tpu.pipeline_mode<synchronous>, transform_indices = @transform_6, window_bounds = array<i64: 1, 8>}, {pipeline_mode = #tpu.pipeline_mode<synchronous>, transform_indices = @transform_7, window_bounds = array<i64: 1, 8>}, {transform_indices = @transform_8, window_bounds = array<i64: 1, 16, 16, 8>}]} {
    %c0 = arith.constant 0 : index
    %c0_0 = arith.constant 0 : index
    %c0_1 = arith.constant 0 : index
    %c0_2 = arith.constant 0 : index
    %0 = vector.load %arg1[%c0, %c0_0, %c0_1, %c0_2] : memref<1x16x16x4xbf16, #tpu.memory_space<vmem>>, vector<1x16x16x4xbf16>
    %1 = vector.shape_cast %0 : vector<1x16x16x4xbf16> to vector<16x16x4xbf16>
    %2 = vector.shape_cast %1 : vector<16x16x4xbf16> to vector<256x4xbf16>
    %c0_3 = arith.constant 0 : index
    %c0_4 = arith.constant 0 : index
    %3 = vector.load %arg2[%c0_3, %c0_4] : memref<4x10xbf16, #tpu.memory_space<vmem>>, vector<4x10xbf16>
    %cst = arith.constant dense<0.000000e+00> : vector<256x10xf32>
    %4 = tpu.matmul %2, %3, %cst {dimension_numbers = #tpu.dot_dimension_numbers<[1], [0], [0], [1], [0, 0, 1, 1], [], []>} : vector<256x4xbf16>, vector<4x10xbf16>, vector<256x10xf32> -> vector<256x10xf32>
    %5 = vector.extract_strided_slice %4 {offsets = [0, 0], sizes = [256, 2], strides = [1, 1]} : vector<256x10xf32> to vector<256x2xf32>
    %c0_5 = arith.constant 0 : index
    %c0_6 = arith.constant 0 : index
    %6 = vector.load %arg3[%c0_5, %c0_6] : memref<1x2xf32, #tpu.memory_space<vmem>>, vector<1x2xf32>
    %7 = vector.broadcast %6 : vector<1x2xf32> to vector<256x2xf32>
    %8 = arith.addf %5, %7 : vector<256x2xf32>
    %cst_7 = arith.constant 0.000000e+00 : f32
    %9 = vector.broadcast %cst_7 : f32 to vector<256x2xf32>
    %10 = arith.maximumf %8, %9 : vector<256x2xf32>
    %11 = vector.extract_strided_slice %4 {offsets = [0, 2], sizes = [256, 8], strides = [1, 1]} : vector<256x10xf32> to vector<256x8xf32>
    %c0_8 = arith.constant 0 : index
    %c0_9 = arith.constant 0 : index
    %12 = vector.load %arg8[%c0_8, %c0_9] : memref<1x8xf32, #tpu.memory_space<vmem>>, vector<1x8xf32>
    %13 = vector.broadcast %12 : vector<1x8xf32> to vector<256x8xf32>
    %14 = arith.addf %11, %13 : vector<256x8xf32>
    %15 = vector.shape_cast %10 : vector<256x2xf32> to vector<16x16x2xf32>
    %cst_10 = arith.constant 0.000000e+00 : f32
    %16 = vector.broadcast %cst_10 : f32 to vector<1x16x2xf32>
    %cst_11 = arith.constant 0.000000e+00 : f32
    %17 = vector.broadcast %cst_11 : f32 to vector<16x1x2xf32>
    %18 = vector.extract_strided_slice %15 {offsets = [0, 0, 0], sizes = [15, 16, 2], strides = [1, 1, 1]} : vector<16x16x2xf32> to vector<15x16x2xf32>
    %19 = tpu.concatenate %16, %18 in 0 : vector<1x16x2xf32>, vector<15x16x2xf32> -> vector<16x16x2xf32>
    %20 = vector.extract_strided_slice %15 {offsets = [1, 0, 0], sizes = [15, 16, 2], strides = [1, 1, 1]} : vector<16x16x2xf32> to vector<15x16x2xf32>
    %21 = tpu.concatenate %20, %16 in 0 : vector<15x16x2xf32>, vector<1x16x2xf32> -> vector<16x16x2xf32>
    %22 = vector.extract_strided_slice %19 {offsets = [0, 0, 0], sizes = [16, 15, 2], strides = [1, 1, 1]} : vector<16x16x2xf32> to vector<16x15x2xf32>
    %23 = tpu.concatenate %17, %22 in 1 : vector<16x1x2xf32>, vector<16x15x2xf32> -> vector<16x16x2xf32>
    %24 = vector.extract_strided_slice %19 {offsets = [0, 1, 0], sizes = [16, 15, 2], strides = [1, 1, 1]} : vector<16x16x2xf32> to vector<16x15x2xf32>
    %25 = tpu.concatenate %24, %17 in 1 : vector<16x15x2xf32>, vector<16x1x2xf32> -> vector<16x16x2xf32>
    %26 = vector.extract_strided_slice %15 {offsets = [0, 0, 0], sizes = [16, 15, 2], strides = [1, 1, 1]} : vector<16x16x2xf32> to vector<16x15x2xf32>
    %27 = tpu.concatenate %17, %26 in 1 : vector<16x1x2xf32>, vector<16x15x2xf32> -> vector<16x16x2xf32>
    %28 = vector.extract_strided_slice %15 {offsets = [0, 1, 0], sizes = [16, 15, 2], strides = [1, 1, 1]} : vector<16x16x2xf32> to vector<16x15x2xf32>
    %29 = tpu.concatenate %28, %17 in 1 : vector<16x15x2xf32>, vector<16x1x2xf32> -> vector<16x16x2xf32>
    %30 = vector.extract_strided_slice %21 {offsets = [0, 0, 0], sizes = [16, 15, 2], strides = [1, 1, 1]} : vector<16x16x2xf32> to vector<16x15x2xf32>
    %31 = tpu.concatenate %17, %30 in 1 : vector<16x1x2xf32>, vector<16x15x2xf32> -> vector<16x16x2xf32>
    %32 = vector.extract_strided_slice %21 {offsets = [0, 1, 0], sizes = [16, 15, 2], strides = [1, 1, 1]} : vector<16x16x2xf32> to vector<16x15x2xf32>
    %33 = tpu.concatenate %32, %17 in 1 : vector<16x15x2xf32>, vector<16x1x2xf32> -> vector<16x16x2xf32>
    %34 = tpu.concatenate %23, %19, %25, %27, %15, %29, %31, %21, %33 in 2 : vector<16x16x2xf32>, vector<16x16x2xf32>, vector<16x16x2xf32>, vector<16x16x2xf32>, vector<16x16x2xf32>, vector<16x16x2xf32>, vector<16x16x2xf32>, vector<16x16x2xf32>, vector<16x16x2xf32> -> vector<16x16x18xf32>
    %35 = vector.shape_cast %34 : vector<16x16x18xf32> to vector<256x18xf32>
    %36 = arith.truncf %35 : vector<256x18xf32> to vector<256x18xbf16>
    %c0_12 = arith.constant 0 : index
    %c0_13 = arith.constant 0 : index
    %37 = vector.load %arg4[%c0_12, %c0_13] : memref<18x2xbf16, #tpu.memory_space<vmem>>, vector<18x2xbf16>
    %cst_14 = arith.constant dense<0.000000e+00> : vector<256x2xf32>
    %38 = tpu.matmul %36, %37, %cst_14 {dimension_numbers = #tpu.dot_dimension_numbers<[1], [0], [0], [1], [0, 0, 1, 1], [], []>} : vector<256x18xbf16>, vector<18x2xbf16>, vector<256x2xf32> -> vector<256x2xf32>
    %c0_15 = arith.constant 0 : index
    %c0_16 = arith.constant 0 : index
    %39 = vector.load %arg5[%c0_15, %c0_16] : memref<1x2xf32, #tpu.memory_space<vmem>>, vector<1x2xf32>
    %40 = vector.broadcast %39 : vector<1x2xf32> to vector<256x2xf32>
    %41 = arith.addf %38, %40 : vector<256x2xf32>
    %cst_17 = arith.constant 0.000000e+00 : f32
    %42 = vector.broadcast %cst_17 : f32 to vector<256x2xf32>
    %43 = arith.maximumf %41, %42 : vector<256x2xf32>
    %44 = arith.truncf %43 : vector<256x2xf32> to vector<256x2xbf16>
    %c0_18 = arith.constant 0 : index
    %c0_19 = arith.constant 0 : index
    %45 = vector.load %arg6[%c0_18, %c0_19] : memref<2x8xbf16, #tpu.memory_space<vmem>>, vector<2x8xbf16>
    %cst_20 = arith.constant dense<0.000000e+00> : vector<256x8xf32>
    %46 = tpu.matmul %44, %45, %cst_20 {dimension_numbers = #tpu.dot_dimension_numbers<[1], [0], [0], [1], [0, 0, 1, 1], [], []>} : vector<256x2xbf16>, vector<2x8xbf16>, vector<256x8xf32> -> vector<256x8xf32>
    %c0_21 = arith.constant 0 : index
    %c0_22 = arith.constant 0 : index
    %47 = vector.load %arg7[%c0_21, %c0_22] : memref<1x8xf32, #tpu.memory_space<vmem>>, vector<1x8xf32>
    %48 = vector.broadcast %47 : vector<1x8xf32> to vector<256x8xf32>
    %49 = arith.addf %46, %48 : vector<256x8xf32>
    %50 = arith.addf %49, %14 : vector<256x8xf32>
    %cst_23 = arith.constant 0.000000e+00 : f32
    %51 = vector.broadcast %cst_23 : f32 to vector<256x8xf32>
    %52 = arith.maximumf %50, %51 : vector<256x8xf32>
    %53 = vector.shape_cast %52 : vector<256x8xf32> to vector<1x16x16x8xf32>
    %c0_24 = arith.constant 0 : index
    %c0_25 = arith.constant 0 : index
    %c0_26 = arith.constant 0 : index
    %c0_27 = arith.constant 0 : index
    %54 = vector.load %arg9[%c0_24, %c0_25, %c0_26, %c0_27] : memref<1x16x16x8xf32, #tpu.memory_space<vmem>>, vector<1x16x16x8xf32>
    tpu.vector_store %arg9[%c0_24, %c0_25, %c0_26, %c0_27], %53 {strides = array<i32>} : memref<1x16x16x8xf32, #tpu.memory_space<vmem>>, vector<1x16x16x8xf32>,
    return
  }
  func.func @transform_0(%arg0: i32) -> (i32, i32, i32, i32) {
    %c0_i32 = arith.constant 0 : i32
    %c0_i32_0 = arith.constant 0 : i32
    %c0_i32_1 = arith.constant 0 : i32
    %c0_i32_2 = arith.constant 0 : i32
    return %arg0, %c0_i32, %c0_i32_0, %c0_i32_1 : i32, i32, i32, i32
  }
  func.func @transform_1(%arg0: i32) -> (i32, i32) {
    %c0_i32 = arith.constant 0 : i32
    %c0_i32_0 = arith.constant 0 : i32
    %c0_i32_1 = arith.constant 0 : i32
    return %c0_i32, %c0_i32_0 : i32, i32
  }
  func.func @transform_2(%arg0: i32) -> (i32, i32) {
    %c0_i32 = arith.constant 0 : i32
    %c0_i32_0 = arith.constant 0 : i32
    %c0_i32_1 = arith.constant 0 : i32
    return %c0_i32, %c0_i32_0 : i32, i32
  }
  func.func @transform_3(%arg0: i32) -> (i32, i32) {
    %c0_i32 = arith.constant 0 : i32
    %c0_i32_0 = arith.constant 0 : i32
    %c0_i32_1 = arith.constant 0 : i32
    return %c0_i32, %c0_i32_0 : i32, i32
  }
  func.func @transform_4(%arg0: i32) -> (i32, i32) {
    %c0_i32 = arith.constant 0 : i32
    %c0_i32_0 = arith.constant 0 : i32
    %c0_i32_1 = arith.constant 0 : i32
    return %c0_i32, %c0_i32_0 : i32, i32
  }
  func.func @transform_5(%arg0: i32) -> (i32, i32) {
    %c0_i32 = arith.constant 0 : i32
    %c0_i32_0 = arith.constant 0 : i32
    %c0_i32_1 = arith.constant 0 : i32
    return %c0_i32, %c0_i32_0 : i32, i32
  }
  func.func @transform_6(%arg0: i32) -> (i32, i32) {
    %c0_i32 = arith.constant 0 : i32
    %c0_i32_0 = arith.constant 0 : i32
    %c0_i32_1 = arith.constant 0 : i32
    return %c0_i32, %c0_i32_0 : i32, i32
  }
  func.func @transform_7(%arg0: i32) -> (i32, i32) {
    %c0_i32 = arith.constant 0 : i32
    %c0_i32_0 = arith.constant 0 : i32
    %c0_i32_1 = arith.constant 0 : i32
    return %c0_i32, %c0_i32_0 : i32, i32
  }
  func.func @transform_8(%arg0: i32) -> (i32, i32, i32, i32) {
    %c0_i32 = arith.constant 0 : i32
    %c0_i32_0 = arith.constant 0 : i32
    %c0_i32_1 = arith.constant 0 : i32
    %c0_i32_2 = arith.constant 0 : i32
    return %arg0, %c0_i32, %c0_i32_0, %c0_i32_1 : i32, i32, i32, i32
  }
}

</mosaic_0001>

<bundles_post_ra>
// kernel: tpu_custom_call.1
= control target key start
LH: loop header
LB: loop body
LE: loop exit
PB: predicated region body
PF: predicated region fallthrough
CT: control target
= control target key end

     0   :  { %s3793_s27 = smov 0   ;;  %s5823_s0 = inlined_call_operand.vmem [shape: bf16[2,16,16,4], index: 0, kind: input, shape index: {}]   ;;  %s5824_s1 = inlined_call_operand.vmem [shape: bf16[4,10], index: 1, kind: input, shape index: {}]   ;;  %s5825_s2 = inlined_call_operand.vmem [shape: f32[1,2], index: 2, kind: input, shape index: {}]   ;;  %s5826_s3 = inlined_call_operand.vmem [shape: bf16[18,2], index: 3, kind: input, shape index: {}]   ;;  %s5827_s4 = inlined_call_operand.vmem [shape: f32[1,2], index: 4, kind: input, shape index: {}]   ;;  %s5828_s5 = inlined_call_operand.vmem [shape: bf16[2,8], index: 5, kind: input, shape index: {}]   ;;  %s5829_s6 = inlined_call_operand.vmem [shape: f32[1,8], index: 6, kind: input, shape index: {}]   ;;  %s5830_s7 = inlined_call_operand.vmem [shape: f32[1,8], index: 7, kind: input, shape index: {}]   ;;  %s5831_s8 = inlined_call_operand.vmem [shape: f32[2,16,16,8], index: 8, kind: output, shape index: {}]  }
   0x1 LB: > { %s2819_s28 = sadd.s32 4294967295, %s3736_s27   ;;  %p2823_p0 = scmp.ge.s32.totalorder %s3736_s27, 1  ;;  %s3736_s27 = sphi %s3793_s27, %s18_s27  }
   0x2   : > { %p262_p1 = scmp.lt.s32.totalorder %s3736_s27, 3 }
   0x4   : > { %p263_p2 = pnand %p2823_p0, %p262_p1 }
   0x6   : > { %266 = sbr.rel (%p263_p2) target bundleno = 1060 (0x424), region = 52 }
   0xd   : > { %v339_v0 = vld [vmem:[%s5824_s1] sm:$0x3]  ;;  %vm469_vm0 = vcmask 1041408   ;;  %p296_p3 = scmp.lt.s32.totalorder %s2819_s28, 1  ;;  %s3738_s11 = smov 2   ;;  %vm420_vm1 = vcmask 31744  }
   0xe   : > { %3060 = vmatprep.subr.msk.bf16.mxu0 %vm469_vm0, %v339_v0  ;;  %3061 = vmatprep.subr.msk.bf16.mxu1 %vm469_vm0, %v339_v0  ;;  %v471_v1 = vsel %vm469_vm0, %v339_v0, 0  ;;  %v2861_v2 = vld [vmem:[%s5830_s7] ss:$0 sm:$0xff]  ;;  %v5832_v19 = vmov 0.0   ;;  %vm873_vm2 = vcmask 1046528   ;;  %s3740_s16 = smov 4  }
   0xf   : > { %2955 = vmatpush3.bf16.msra.mxu0 %v471_v1  ;;  %3059 = vmatpush3.bf16.msra.mxu1 %v471_v1  ;;  %s6115_s28 = smov (!%p296_p3, %s2819_s28), 1  ;;  %v874_v20 = vrot.slane %v5832_v19, 1  ;;  %v3857_v23 = vld [vmem:[%s5825_s2] ss:$0 sm:$0xff]  ;;  %s3741_s19 = smov 14   ;;  %vm777_vm3 = vcmask 1040384  }
  0x10   : > { %711 = vrot.lane.b32.xlu0 %v2861_v2, %s3738_s11  ;;  %s2900_s12 = sshll.u32 %s6115_s28, 7  ;;  %s3742_s20 = smov 8   ;;  %vm1761_vm4 = vcmask 15360   ;;  %vm1826_vm5 = vcmask 48128   ;;  %vm1859_vm6 = vcmask 64512   ;;  %vm1892_vm7 = vcmask 80896  }
  0x11   : > { %s3814_s15 = scalar_lea.vmem %s5823_s0, %s2900_s12  ;;  %v937_v21 = vsel %vm873_vm2, %v874_v20, 0.0  ;;  %s3743_s21 = smov 6   ;;  %vm1925_vm8 = vcmask 97280   ;;  %vm1958_vm9 = vcmask 113664   ;;  %vm1991_vm10 = vcmask 130048  }
  0x12   : > { %v3712_v3 = vld [vmem:[%s3814_s15] sm:$0xff]   ;;  %v3714_v5 = vld [vmem:[%s3814_s15 + $0x8] sm:$0xff]   ;;  %v3716_v7 = vld [vmem:[%s3814_s15 + $0x10] sm:$0xff]   ;;  %v3850_v22 = vpack.i.bf16 %v937_v21, %v874_v20  ;;  %s3744_s22 = smov 12   ;;  %s3745_s23 = smov 10   ;;  %vm2059_vm11 = vcmask 146432  }
  0x13   : > { %v3713_v4 = vld [vmem:[%s3814_s15 + $0x40] sm:$0xff]   ;;  %2956 = vmatprep.mubr.msk.bf16.mxu0 %vm420_vm1, %v3712_v3  ;;  %v3715_v6 = vld [vmem:[%s3814_s15 + $0x48] sm:$0xff]   ;;  %v3717_v8 = vld [vmem:[%s3814_s15 + $0x50] sm:$0xff]   ;;  %s3746_s24 = smov 16   ;;  %s3747_s9 = smov 126  }
  0x14   : > { %2972 = vmatprep.mubr.msk.bf16.mxu1 %vm420_vm1, %v3713_v4  ;;  %2957 = vmatmul.mubr.msk.bf16.vlgmr.msra.gmra.mrb[0].mxu0 %vm420_vm1, %v3714_v5  ;;  %v3718_v9 = vld [vmem:[%s3814_s15 + $0x18] sm:$0xff]   ;;  %v3720_v11 = vld [vmem:[%s3814_s15 + $0x20] sm:$0xff]   ;;  %v3721_v13 = vld [vmem:[%s3814_s15 + $0x28] sm:$0xff]   ;;  %5921 = vst [vmem:[#allocation2_spill] sm:$0xff] %v3850_v22 }
  0x15   : > { %2973 = vmatmul.mubr.msk.bf16.vlgmr.msra.gmra.mrb[0].mxu1 %vm420_vm1, %v3715_v6  ;;  %2960 = vmatprep.mubr.msk.bf16.mxu0 %vm420_vm1, %v3716_v7  ;;  %v3719_v10 = vld [vmem:[%s3814_s15 + $0x58] sm:$0xff]   ;;  %v3724_v12 = vld [vmem:[%s3814_s15 + $0x60] sm:$0xff]   ;;  %v3722_v14 = vld [vmem:[%s3814_s15 + $0x30] sm:$0xff]  }
  0x16   : > { %2976 = vmatprep.mubr.msk.bf16.mxu1 %vm420_vm1, %v3717_v8  ;;  %v3725_v15 = vld [vmem:[%s3814_s15 + $0x68] sm:$0xff]   ;;  %v3726_v16 = vld [vmem:[%s3814_s15 + $0x70] sm:$0xff]   ;;  %v3723_v17 = vld [vmem:[%s3814_s15 + $0x38] sm:$0xff]   ;;  %3083 = vrot.lane.b32.xlu1 %v3850_v22, %s3740_s16 }
  0x17   : > { %v3727_v18 = vld [vmem:[%s3814_s15 + $0x78] sm:$0xff]  }
  0x1c   : > { %2961 = vmatmul.mubr.msk.bf16.gmra.mrb[4].mxu0 %vm420_vm1, %v3718_v9 }
  0x1d   : > { %2977 = vmatmul.mubr.msk.bf16.gmra.mrb[4].mxu1 %vm420_vm1, %v3719_v10  ;;  %2964 = vmatprep.mubr.msk.bf16.mxu0 %vm420_vm1, %v3720_v11 }
  0x1e   : > { %2980 = vmatprep.mubr.msk.bf16.mxu1 %vm420_vm1, %v3724_v12 }
  0x24   : > { %2965 = vmatmul.mubr.msk.bf16.gmra.mrb[8].mxu0 %vm420_vm1, %v3721_v13 }
  0x25   : > { %2968 = vmatprep.mubr.msk.bf16.mxu0 %vm420_vm1, %v3722_v14  ;;  %2981 = vmatmul.mubr.msk.bf16.gmra.mrb[8].mxu1 %vm420_vm1, %v3725_v15 }
  0x26   : > { %2984 = vmatprep.mubr.msk.bf16.mxu1 %vm420_vm1, %v3726_v16 }
  0x2c   : > { %2969 = vmatmul.mubr.msk.bf16.gmra.mrb[12].mxu0 %vm420_vm1, %v3723_v17 }
  0x2d   : > { %2985 = vmatmul.mubr.msk.bf16.gmra.mrb[12].mxu1 %vm420_vm1, %v3727_v18 }
  0xe7   : > { %v3859_v24 = vpop.f32.mrb[0].mxu0 }
  0xe8   : > { %5922 = vst [vmem:[#allocation3_spill] sm:$0xff] %v3859_v24  ;;  %v643_v25 = vadd.f32 %v3859_v24, %v3857_v23  ;;  %v3863_v26 = vpop.f32.mrb[1].mxu0  ;;  %v3865_v27 = vpop.f32.mrb[0].mxu1 }
  0xe9   : > { %5923 = vst [vmem:[#allocation4_spill] sm:$0xff] %v3863_v26  ;;  %5924 = vst [vmem:[#allocation5_spill] sm:$0xff] %v3865_v27  ;;  %v641_v28 = vadd.f32 %v3857_v23, %v3863_v26  ;;  %v3869_v29 = vpop.f32.mrb[2].mxu0  ;;  %v659_v30 = vadd.f32 %v3865_v27, %v3857_v23  ;;  %v3873_v31 = vpop.f32.mrb[1].mxu1 }
  0xea   : > { %5925 = vst [vmem:[#allocation6_spill] sm:$0xff] %v3869_v29  ;;  %5926 = vst [vmem:[#allocation7_spill] sm:$0xff] %v3873_v31  ;;  %v644_v32 = vadd.f32 %v3869_v29, %v3857_v23  ;;  %v3877_v33 = vpop.f32.mrb[3].mxu0  ;;  %v3879_v34 = vpop.f32.mrb[2].mxu1  ;;  %v3881_v35 = vmax.f32 %v643_v25, 0.0  ;;  %v657_v41 = vadd.f32 %v3857_v23, %v3873_v31 }
  0xeb   : > { %5927 = vst [vmem:[#allocation8_spill] sm:$0xff] %v3877_v33  ;;  %5928 = vst [vmem:[#allocation9_spill] sm:$0xff] %v3879_v34  ;;  %v3883_v36 = vmax.f32 %v641_v28, 0.0  ;;  %v642_v37 = vadd.f32 %v3857_v23, %v3877_v33  ;;  %v3887_v38 = vpop.f32.mrb[3].mxu1  ;;  %v3891_v40 = vmax.f32 %v659_v30, 0.0  ;;  %v660_v42 = vadd.f32 %v3879_v34, %v3857_v23 }
  0xec   : > { %5929 = vst [vmem:[#allocation10_spill] sm:$0xff] %v3887_v38  ;;  %v3889_v39 = vmax.f32 %v644_v32, 0.0  ;;  %v658_v44 = vadd.f32 %v3857_v23, %v3887_v38  ;;  %v3913_v51 = vmax.f32 %v657_v41, 0.0  ;;  %v783_v61 = vrot.slane %v3881_v35, 7 }
  0xed   : > { %v3897_v43 = vmax.f32 %v642_v37, 0.0  ;;  %v3901_v45 = vmax.f32 %v660_v42, 0.0  ;;  %v3087_v46 = vpack.i.bf16 %v3883_v36, %v5832_v19  ;;  %v879_v3 = vrot.slane %v3881_v35, 1 }
  0xee   : > { %v3097_v47 = vpack.i.bf16 %v3889_v39, %v3881_v35  ;;  %v3915_v52 = vmax.f32 %v658_v44, 0.0  ;;  %v784_v58 = vrot.slane %v3889_v39, 7  ;;  %v880_v4 = vrot.slane %v3889_v39, 1 }
  0xef   : > { %v3907_v48 = vpop.f32.mrb[4].mxu0  ;;  %v3112_v49 = vpack.i.bf16 %v3881_v35, %v3897_v43  ;;  %v3117_v50 = vpack.i.bf16 %v3897_v43, %v3883_v36  ;;  %3088 = vrot.lane.b32.xlu0 %v3087_v46, %s3738_s11  ;;  %v3107_v55 = vpack.i.bf16 %v3901_v45, %v3891_v40  ;;  %v5834_v6 = vrot.slane %v3891_v40, 7 }
  0xf0   : > { %5930 = vst [vmem:[#allocation11_spill] sm:$0xff] %v3907_v48  ;;  %v3917_v53 = vpop.f32.mrb[4].mxu1  ;;  %3098 = vrot.lane.b32.xlu1 %v3097_v47, %s3741_s19  ;;  %v3921_v54 = vpop.f32.mrb[5].mxu0  ;;  %v3122_v0 = vpack.i.bf16 %v3915_v52, %v3913_v51  ;;  %v3127_v1 = vpack.i.bf16 %v3891_v40, %v3915_v52  ;;  %v3948_v2 = vsel %vm777_vm3, %v783_v61, %v784_v58  ;;  %v808_v7 = vrot.slane %v3901_v45, 7 }
  0xf1   : > { %5931 = vst [vmem:[#allocation12_spill] sm:$0xff] %v3917_v53  ;;  %5932 = vst [vmem:[#allocation13_spill] sm:$0xff] %v3921_v54  ;;  %v3925_v56 = vpop.f32.mrb[5].mxu1  ;;  %v3927_v57 = vpop.f32.mrb[6].mxu0  ;;  %v881_v10 = vsel %vm873_vm2, %v879_v3, %v880_v4  ;;  %v939_v11 = vsel %vm873_vm2, %v880_v4, 0.0  ;;  %v647_v30 = vadd.f32 %v3907_v48, %v3857_v23  ;;  %v903_v32 = vrot.slane %v3891_v40, 1 }
  0xf2   : > { %5933 = vst [vmem:[#allocation14_spill] sm:$0xff] %v3925_v56  ;;  %5934 = vst [vmem:[#allocation15_spill] sm:$0xff] %v3927_v57  ;;  %v3930_v59 = vpop.f32.mrb[7].mxu0  ;;  %v3932_v60 = vpop.f32.mrb[6].mxu1  ;;  %v3974_v15 = vpack.i.bf16 %v939_v11, %v881_v10  ;;  %v3987_v20 = vsel %vm777_vm3, %v5834_v6, %v808_v7  ;;  %v663_v35 = vadd.f32 %v3917_v53, %v3857_v23  ;;  %v904_v42 = vrot.slane %v3901_v45, 1 }
  0xf3   : > { %5935 = vst [vmem:[#allocation16_spill] sm:$0xff] %v3930_v59  ;;  %5936 = vst [vmem:[#allocation17_spill] sm:$0xff] %v3932_v60  ;;  %v3935_v62 = vpop.f32.mrb[7].mxu1  ;;  %3093 = vrot.lane.b32.xlu0 %v3097_v47, %s3742_s20  ;;  %v3941_v63 = vadd.f32 %v3857_v23, %v3930_v59  ;;  %v661_v37 = vadd.f32 %v3857_v23, %v3925_v56  ;;  %v645_v41 = vadd.f32 %v3857_v23, %v3921_v54 }
  0xf4   : > { %5937 = vst [vmem:[#allocation18_spill] sm:$0xff] %v3935_v62  ;;  %3108 = vrot.lane.b32.xlu1 %v3107_v55, %s3741_s19  ;;  %v648_v44 = vadd.f32 %v3927_v57, %v3857_v23  ;;  %v876_v46 = vrot.slane %v3883_v36, 1  ;;  %v877_v47 = vrot.slane %v3897_v43, 1  ;;  %v947_v58 = vsel %vm873_vm2, %v904_v42, 0.0 }
  0xf5   : > { %v805_v3 = vrot.slane %v3915_v52, 7  ;;  %v662_v4 = vadd.f32 %v3857_v23, %v3935_v62  ;;  %v4030_v11 = vsel %vm777_vm3, 0.0, %v783_v61  ;;  %v5961_v31 = vrot.slane %v3913_v51, 7 }
  0xf7   : > { %v3952_v5 = vpop.f32.mrb[8].mxu0  ;;  %3103 = vrot.lane.b32.xlu0 %v3107_v55, %s3742_s20  ;;  %v905_v55 = vsel %vm873_vm2, %v903_v32, %v904_v42  ;;  %v938_v42 = vsel %vm873_vm2, %v877_v47, 0.0 }
  0xf8   : > { %5938 = vst [vmem:[#allocation19_spill] sm:$0xff] %v3952_v5  ;;  %3113 = vrot.lane.b32.xlu1 %v3112_v49, %s3738_s11  ;;  %v3960_v8 = vadd.f32 %v3952_v5, %v3857_v23  ;;  %v3962_v9 = vpop.f32.mrb[9].mxu0  ;;  %v3966_v12 = vpop.f32.mrb[8].mxu1  ;;  %v4032_v32 = vpack.i.bf16 %v947_v58, %v905_v55  ;;  %v878_v49 = vsel %vm873_vm2, %v876_v46, %v877_v47 }
  0xf9   : > { %5939 = vst [vmem:[#allocation20_spill] sm:$0xff] %v3962_v9  ;;  %5940 = vst [vmem:[#allocation21_spill] sm:$0xff] %v3966_v12  ;;  %v3970_v13 = vadd.f32 %v3857_v23, %v3962_v9  ;;  %v3972_v14 = vpop.f32.mrb[10].mxu0  ;;  %v3976_v16 = vpop.f32.mrb[9].mxu1  ;;  %v4052_v55 = vpack.i.bf16 %v938_v42, %v878_v49  ;;  %v664_v58 = vadd.f32 %v3932_v60, %v3857_v23  ;;  %v4071_v49 = vmax.f32 %v647_v30, 0.0 }
  0xfa   : > { %5941 = vst [vmem:[#allocation22_spill] sm:$0xff] %v3972_v14  ;;  %5942 = vst [vmem:[#allocation23_spill] sm:$0xff] %v3976_v16  ;;  %v3980_v17 = vadd.f32 %v3972_v14, %v3857_v23  ;;  %v3982_v18 = vpop.f32.mrb[11].mxu0  ;;  %v3989_v21 = vpop.f32.mrb[10].mxu1  ;;  %v5953_v14 = vrot.slane %v3913_v51, 7  ;;  %v4075_v42 = vmax.f32 %v661_v37, 0.0 }
  0xfb   : > { %5943 = vst [vmem:[#allocation24_spill] sm:$0xff] %v3982_v18  ;;  %5944 = vst [vmem:[#allocation25_spill] sm:$0xff] %v3989_v21  ;;  %v3993_v25 = vadd.f32 %v3857_v23, %v3982_v18  ;;  %v3995_v28 = vpop.f32.mrb[11].mxu1  ;;  %3123 = vrot.lane.b32.xlu0 %v3122_v0, %s3741_s19  ;;  %v4060_v18 = vmax.f32 %v645_v41, 0.0  ;;  %v4077_v41 = vmax.f32 %v648_v44, 0.0  ;;  %v4088_v30 = vmax.f32 %v3941_v63, 0.0 }
  0xfc   : > { %5945 = vst [vmem:[#allocation26_spill] sm:$0xff] %v3995_v28  ;;  %3118 = vrot.lane.b32.xlu1 %v3117_v50, %s3742_s20  ;;  %v4065_v46 = vsel %vm777_vm3, %v5953_v14, %v805_v3  ;;  %v4081_v14 = vadd.f32 %v3966_v12, %v3857_v23  ;;  %v4090_v3 = vmax.f32 %v664_v58, 0.0  ;;  %v900_v60 = vrot.slane %v3913_v51, 1 }
  0xfd   : > { %5954 = vst [vmem:[#allocation34_spill] sm:$0xff] %v4065_v46  ;;  %v901_v37 = vrot.slane %v3915_v52, 1  ;;  %v5956_v44 = vrot.slane %v3891_v40, 7  ;;  %v780_v12 = vrot.slane %v3883_v36, 7  ;;  %v781_v9 = vrot.slane %v3897_v43, 7 }
  0xfe   : > { %v4107_v52 = vmax.f32 %v662_v4, 0.0  ;;  %v4130_v4 = vpack.i.bf16 %v4088_v30, %v4060_v18  ;;  %v790_v58 = vrot.slane %v4077_v41, 7  ;;  %v885_v5 = vrot.slane %v4071_v49, 1 }
  0xff   : > { %v4014_v50 = vpop.f32.mrb[12].mxu0  ;;  %3128 = vrot.lane.b32.xlu0 %v3127_v1, %s3738_s11  ;;  %v902_v40 = vsel %vm873_vm2, %v900_v60, %v901_v37  ;;  %v946_v63 = vsel %vm873_vm2, %v901_v37, 0.0  ;;  %v4114_v43 = vsel %vm777_vm3, %v780_v12, %v781_v9  ;;  %v886_v9 = vrot.slane %v4077_v41, 1 }
 0x100   : > { %5946 = vst [vmem:[#allocation27_spill] sm:$0xff] %v4014_v50  ;;  %v4024_v7 = vadd.f32 %v4014_v50, %v3857_v23  ;;  %3133 = vrot.lane.b32.xlu1 %v3122_v0, %s3742_s20  ;;  %v4027_v10 = vpop.f32.mrb[13].mxu0  ;;  %v4035_v19 = vpop.f32.mrb[12].mxu1  ;;  %v3137_v0 = vpack.i.bf16 %v3948_v2, %v4030_v11  ;;  %v4111_v36 = vpack.i.bf16 %v946_v63, %v902_v40  ;;  %v5852_v40 = vrot.slane %v4071_v49, 7 }
 0x101   : > { %5947 = vst [vmem:[#allocation28_spill] sm:$0xff] %v4027_v10  ;;  %5948 = vst [vmem:[#allocation29_spill] sm:$0xff] %v4035_v19  ;;  %v4039_v1 = vadd.f32 %v3857_v23, %v4027_v10  ;;  %v4041_v6 = vpop.f32.mrb[14].mxu0  ;;  %v4046_v62 = vpop.f32.mrb[13].mxu1  ;;  %v4139_v37 = vpack.i.bf16 %v4107_v52, %v4075_v42  ;;  %v814_v57 = vrot.slane %v4090_v3, 7  ;;  %v910_v56 = vrot.slane %v4090_v3, 1 }
 0x102   : > { %5949 = vst [vmem:[#allocation30_spill] sm:$0xff] %v4041_v6  ;;  %5950 = vst [vmem:[#allocation31_spill] sm:$0xff] %v4046_v62  ;;  %v4050_v61 = vadd.f32 %v4041_v6, %v3857_v23  ;;  %v4056_v10 = vpop.f32.mrb[14].mxu1  ;;  %v4058_v50 = vpop.f32.mrb[15].mxu0  ;;  %v4069_v6 = vmax.f32 %v663_v35, 0.0  ;;  %v4085_v35 = vadd.f32 %v3857_v23, %v3976_v16  ;;  %v4122_v16 = vpack.i.bf16 %v4077_v41, %v4071_v49 }
 0x103   : > { %5951 = vst [vmem:[#allocation32_spill] sm:$0xff] %v4056_v10  ;;  %5952 = vst [vmem:[#allocation33_spill] sm:$0xff] %v4058_v50  ;;  %v4067_v47 = vpop.f32.mrb[15].mxu1  ;;  %3138 = vrot.lane.b32.xlu0 %v3137_v0, %s3743_s21  ;;  %v887_v63 = vsel %vm873_vm2, %v885_v5, %v886_v9  ;;  %v941_v59 = vsel %vm873_vm2, %v886_v9, 0.0  ;;  %v949_v34 = vsel %vm873_vm2, %v910_v56, 0.0  ;;  %v4338_v22 = vmax.f32 %v4024_v7, 0.0 }
 0x104   : > { %5955 = vst [vmem:[#allocation35_spill] sm:$0xff] %v4067_v47  ;;  %3148 = vrot.lane.b32.xlu1 %v3137_v0, %s3744_s22  ;;  %v4097_v0 = vsel %vm777_vm3, 0.0, %v5956_v44  ;;  %v4126_v60 = vpack.i.bf16 %v4090_v3, %v4069_v6  ;;  %v909_v54 = vrot.slane %v4069_v6, 1  ;;  %v4161_v48 = vpack.i.bf16 %v941_v59, %v887_v63 }
 0x105   : > { %5957 = vst [vmem:[#allocation36_spill] sm:$0xff] %v4097_v0  ;;  %v3162_v44 = vpack.i.bf16 %v3987_v20, %v4097_v0  ;;  %v5959_v53 = vrot.slane %v4069_v6, 7  ;;  %v787_v59 = vrot.slane %v4088_v30, 7  ;;  %v4341_v26 = vmax.f32 %v4039_v1, 0.0 }
 0x106   : > { %v911_v38 = vsel %vm873_vm2, %v909_v54, %v910_v56  ;;  %v883_v54 = vrot.slane %v4088_v30, 1  ;;  %v4344_v0 = vmax.f32 %v4050_v61, 0.0 }
 0x107   : > { %3143 = vrot.lane.b32.xlu0 %v3974_v15, %s3745_s23  ;;  %v4176_v5 = vpack.i.bf16 %v949_v34, %v911_v38  ;;  %v811_v34 = vrot.slane %v4107_v52, 7  ;;  %v668_v38 = vadd.f32 %v3989_v21, %v3857_v23 }
 0x108   : > { %3153 = vrot.lane.b32.xlu1 %v3974_v15, %s3746_s24  ;;  %v940_v63 = vsel %vm873_vm2, %v883_v54, 0.0 }
 0x10b   : > { %3163 = vrot.lane.b32.xlu0 %v3162_v44, %s3743_s21 }
 0x10c   : > { %3158 = vrot.lane.b32.xlu1 %v3974_v15, %s3740_s16  ;;  %v4152_v15 = vsel %vm777_vm3, %v5852_v40, %v790_v58  ;;  %v4166_v58 = vsel %vm777_vm3, %v5959_v53, %v814_v57  ;;  %v5857_v40 = vrot.slane %v4060_v18, 7  ;;  %v882_v53 = vrot.slane %v4060_v18, 1 }
 0x10d   : > { %5958 = vst [vmem:[#allocation37_spill] sm:$0xff] %v4152_v15  ;;  %5960 = vst [vmem:[#allocation38_spill] sm:$0xff] %v4166_v58 }
 0x10e   : > { %v4188_v56 = vsel %vm777_vm3, %v5857_v40, %v787_v59  ;;  %v884_v9 = vsel %vm873_vm2, %v882_v53, %v883_v54  ;;  %v666_v40 = vadd.f32 %v3857_v23, %v3995_v28  ;;  %v4212_v53 = vsel %vm777_vm3, 0.0, %v780_v12 }
 0x10f   : > { %3168 = vrot.lane.b32.xlu0 %v4032_v32, %s3745_s23  ;;  %5963 = vst [vmem:[#allocation40_spill] sm:$0xff] %v4188_v56  ;;  %v4198_v29 = vpack.i.bf16 %v940_v63, %v884_v9  ;;  %v4216_v54 = vadd.f32 %v4035_v19, %v3857_v23  ;;  %v3192_v9 = vpack.i.bf16 %v4114_v43, %v4212_v53  ;;  %v4230_v12 = vmax.f32 %v3960_v8, 0.0 }
 0x110   : > { %3173 = vrot.lane.b32.xlu1 %v3162_v44, %s3744_s22  ;;  %v4174_v44 = vsel %vm777_vm3, 0.0, %v5961_v31  ;;  %v5859_v31 = vrot.slane %v4075_v42, 7  ;;  %v4227_v63 = vadd.f32 %v4056_v10, %v3857_v23  ;;  %v654_v8 = vadd.f32 %v3857_v23, %v4058_v50 }
 0x111   : > { %5962 = vst [vmem:[#allocation39_spill] sm:$0xff] %v4174_v44  ;;  %v3202_v57 = vpack.i.bf16 %v4065_v46, %v4174_v44  ;;  %v906_v44 = vrot.slane %v4075_v42, 1  ;;  %v4236_v46 = vmax.f32 %v4085_v35, 0.0  ;;  %v4252_v35 = vmax.f32 %v4081_v14, 0.0 }
 0x112   : > { %v4203_v59 = vsel %vm777_vm3, %v5859_v31, %v811_v34  ;;  %v4220_v34 = vadd.f32 %v3857_v23, %v4046_v62  ;;  %v4233_v31 = vmax.f32 %v3970_v13, 0.0  ;;  %v4239_v62 = vmax.f32 %v3980_v17, 0.0 }
 0x113   : > { %3188 = vrot.lane.b32.xlu0 %v4052_v55, %s3740_s16  ;;  %5964 = vst [vmem:[#allocation41_spill] sm:$0xff] %v4203_v59  ;;  %v4249_v13 = vmax.f32 %v3993_v25, 0.0  ;;  %v4254_v17 = vmax.f32 %v668_v38, 0.0  ;;  %v4258_v21 = vmax.f32 %v666_v40, 0.0  ;;  %v5965_v25 = vpack.i.bf16 %v4060_v18, %v3889_v39 }
 0x114   : > { %3178 = vrot.lane.b32.xlu1 %v4032_v32, %s3746_s24  ;;  %v5870_v40 = vrot.slane %v4230_v12, 7  ;;  %v796_v38 = vrot.slane %v4239_v62, 7  ;;  %v891_v14 = vrot.slane %v4230_v12, 1  ;;  %v912_v61 = vrot.slane %v4236_v46, 1 }
 0x115   : > { %v4288_v39 = vpack.i.bf16 %v4258_v21, %v4236_v46  ;;  %v817_v7 = vrot.slane %v4258_v21, 7 }
 0x117   : > { %3203 = vrot.lane.b32.xlu0 %v3202_v57, %s3744_s22 }
 0x118   : > { %3183 = vrot.lane.b32.xlu1 %v4032_v32, %s3740_s16  ;;  %v907_v32 = vrot.slane %v4107_v52, 1 }
 0x11a   : > { %v908_v10 = vsel %vm873_vm2, %v906_v44, %v907_v32  ;;  %v948_v19 = vsel %vm873_vm2, %v907_v32, 0.0  ;;  %v670_v44 = vadd.f32 %v3857_v23, %v4067_v47  ;;  %v4278_v23 = vpack.i.bf16 %v4254_v17, %v4252_v35 }
 0x11b   : > { %3213 = vrot.lane.b32.xlu0 %v4111_v36, %s3740_s16  ;;  %v4256_v28 = vpack.i.bf16 %v948_v19, %v908_v10  ;;  %v4274_v19 = vpack.i.bf16 %v4239_v62, %v4230_v12  ;;  %v4282_v10 = vpack.i.bf16 %v4249_v13, %v4233_v31  ;;  %v892_v32 = vrot.slane %v4239_v62, 1 }
 0x11c   : > { %3193 = vrot.lane.b32.xlu1 %v3192_v9, %s3743_s21  ;;  %v5871_v9 = vrot.slane %v4252_v35, 7  ;;  %v820_v47 = vrot.slane %v4254_v17, 7 }
 0x11d   : > { %v893_v50 = vsel %vm873_vm2, %v891_v14, %v892_v32  ;;  %v5877_v14 = vrot.slane %v4233_v31, 7 }
 0x11e   : > { %v4317_v24 = vsel %vm777_vm3, %v5871_v9, %v820_v47 }
 0x11f   : > { %3228 = vrot.lane.b32.xlu0 %v5965_v25, %s3738_s11  ;;  %v5966_v25 = vpack.i.bf16 %v4075_v42, %v3901_v45  ;;  %v943_v45 = vsel %vm873_vm2, %v892_v32, 0.0  ;;  %5968 = vst [vmem:[#allocation43_spill] sm:$0xff] %v4317_v24  ;;  %v793_v32 = vrot.slane %v4249_v13, 7 }
 0x120   : > { %3198 = vrot.lane.b32.xlu1 %v4052_v55, %s3745_s23  ;;  %v4306_v55 = vsel %vm777_vm3, %v5870_v40, %v796_v38  ;;  %v4312_v27 = vpack.i.bf16 %v943_v45, %v893_v50  ;;  %v916_v38 = vrot.slane %v4254_v17, 1  ;;  %v888_v40 = vrot.slane %v4233_v31, 1 }
 0x121   : > { %5967 = vst [vmem:[#allocation42_spill] sm:$0xff] %v4306_v55  ;;  %v889_v50 = vrot.slane %v4249_v13, 1 }
 0x122   : > { %v951_v47 = vsel %vm873_vm2, %v916_v38, 0.0 }
 0x123   : > { %3233 = vrot.lane.b32.xlu0 %v5966_v25, %s3738_s11  ;;  %v915_v25 = vrot.slane %v4252_v35, 1  ;;  %v890_v33 = vsel %vm873_vm2, %v888_v40, %v889_v50  ;;  %v5876_v40 = vrot.slane %v4236_v46, 7 }
 0x124   : > { %3208 = vrot.lane.b32.xlu1 %v4111_v36, %s3746_s24 }
 0x125   : > { %v917_v45 = vsel %vm873_vm2, %v915_v25, %v916_v38  ;;  %v942_v25 = vsel %vm873_vm2, %v889_v50, 0.0  ;;  %v4360_v1 = vsel %vm777_vm3, %v5876_v40, %v817_v7  ;;  %v897_v7 = vrot.slane %v4338_v22, 1 }
 0x126   : > { %v4329_v9 = vpack.i.bf16 %v951_v47, %v917_v45  ;;  %v4351_v38 = vpack.i.bf16 %v942_v25, %v890_v33  ;;  %v913_v45 = vrot.slane %v4258_v21, 1  ;;  %v4369_v33 = vmax.f32 %v4220_v34, 0.0 }
 0x127   : > { %3238 = vrot.lane.b32.xlu0 %v4122_v16, %s3742_s20  ;;  %v4379_v25 = vpack.i.bf16 %v4344_v0, %v4338_v22 }
 0x128   : > { %3218 = vrot.lane.b32.xlu1 %v3202_v57, %s3743_s21  ;;  %v4334_v57 = vsel %vm777_vm3, %v5877_v14, %v793_v32  ;;  %v4355_v32 = vmax.f32 %v654_v8, 0.0  ;;  %v914_v50 = vsel %vm873_vm2, %v912_v61, %v913_v45  ;;  %v950_v47 = vsel %vm873_vm2, %v913_v45, 0.0 }
 0x129   : > { %5969 = vst [vmem:[#allocation44_spill] sm:$0xff] %v4334_v57  ;;  %v5879_v61 = vrot.slane %v4338_v22, 7  ;;  %v5970_v45 = vpack.i.bf16 %v4071_v49, %v4088_v30  ;;  %v5972_v14 = vrot.slane %v4071_v49, 7 }
 0x12a   : > { %v4387_v34 = vpack.i.bf16 %v4355_v32, %v4341_v26 }
 0x12b   : > { %3248 = vrot.lane.b32.xlu0 %v4126_v60, %s3742_s20  ;;  %v4423_v8 = vsel %vm777_vm3, 0.0, %v5972_v14 }
 0x12c   : > { %3223 = vrot.lane.b32.xlu1 %v4111_v36, %s3745_s23  ;;  %v4371_v36 = vmax.f32 %v670_v44, 0.0  ;;  %v898_v44 = vrot.slane %v4344_v0, 1  ;;  %5973 = vst [vmem:[#allocation46_spill] sm:$0xff] %v4423_v8 }
 0x12f   : > { %3258 = vrot.lane.b32.xlu0 %v4130_v4, %s3741_s19 }
 0x130   : > { %3243 = vrot.lane.b32.xlu1 %v4122_v16, %s3741_s19  ;;  %v4383_v16 = vpack.i.bf16 %v950_v47, %v914_v50  ;;  %v802_v50 = vrot.slane %v4344_v0, 7  ;;  %v4401_v47 = vpack.i.bf16 %v4371_v36, %v4369_v33 }
 0x132   : > { %v4410_v30 = vsel %vm777_vm3, %v5879_v61, %v802_v50  ;;  %v5974_v50 = vpack.i.bf16 %v4069_v6, %v4107_v52 }
 0x133   : > { %3263 = vrot.lane.b32.xlu0 %v5970_v45, %s3738_s11  ;;  %5971 = vst [vmem:[#allocation45_spill] sm:$0xff] %v4410_v30  ;;  %v945_v45 = vsel %vm873_vm2, %v898_v44, 0.0 }
 0x134   : > { %3253 = vrot.lane.b32.xlu1 %v4126_v60, %s3741_s19  ;;  %v899_v60 = vsel %vm873_vm2, %v897_v7, %v898_v44  ;;  %v894_v7 = vrot.slane %v4341_v26, 1  ;;  %v895_v44 = vrot.slane %v4355_v32, 1 }
 0x135   : > { %v4414_v40 = vpack.i.bf16 %v945_v45, %v899_v60  ;;  %v5878_v60 = vrot.slane %v4341_v26, 7  ;;  %v799_v45 = vrot.slane %v4355_v32, 7 }
 0x136   : > { %v896_v49 = vsel %vm873_vm2, %v894_v7, %v895_v44  ;;  %v944_v14 = vsel %vm873_vm2, %v895_v44, 0.0 }
 0x137   : > { %3273 = vrot.lane.b32.xlu0 %v4139_v37, %s3741_s19  ;;  %v4441_v52 = vpack.i.bf16 %v944_v14, %v896_v49  ;;  %v3728_v49 = vld [vmem:[%s5826_s3] sm:$0xff]   ;;  %v5978_v14 = vrot.slane %v4060_v18, 7 }
 0x138   : > { %3268 = vrot.lane.b32.xlu1 %v4130_v4, %s3742_s20  ;;  %v3287_v4 = vpack.i.bf16 %v4152_v15, %v4423_v8  ;;  %2988 = vmatprep.subr.bf16.mxu1 %v3728_v49  ;;  %v5982_v15 = vpack.i.bf16 %v4233_v31, %v4077_v41 }
 0x139   : > { %2989 = vmatpush3.bf16.msra.mxu1 %v3728_v49  ;;  %v5979_v49 = vrot.slane %v4075_v42, 7 }
 0x13b   : > { %3278 = vrot.lane.b32.xlu0 %v5974_v50, %s3738_s11  ;;  %v5976_v50 = vrot.slane %v4069_v6, 7  ;;  %v704_v6 = vmax.f32 %v4227_v63, 0.0 }
 0x13c   : > { %3283 = vrot.lane.b32.xlu1 %v4139_v37, %s3742_s20  ;;  %v4446_v37 = vsel %vm777_vm3, %v5878_v60, %v799_v45  ;;  %v4470_v45 = vsel %vm777_vm3, 0.0, %v5978_v14  ;;  %v4490_v60 = vsel %vm777_vm3, 0.0, %v5979_v49  ;;  %v5883_v49 = vrot.slane %v4369_v33, 7 }
 0x13d   : > { %5975 = vst [vmem:[#allocation47_spill] sm:$0xff] %v4446_v37  ;;  %v4451_v7 = vsel %vm777_vm3, 0.0, %v5976_v50  ;;  %v956_v63 = vrot.slane %v704_v6, 7  ;;  %v3729_v50 = vld [vmem:[%s5826_s3 + $0x8] ss:$0 sps:$4 sm:$0x11]  }
 0x13e   : > { %5977 = vst [vmem:[#allocation48_spill] sm:$0xff] %v4451_v7  ;;  %v3312_v44 = vpack.i.bf16 %v4166_v58, %v4451_v7  ;;  %v2109_v18 = vsel %vm777_vm3, %v3729_v50, 0  ;;  %3062 = vmatprep.subr.msk.bf16.mxu1 %vm777_vm3, %v3729_v50  ;;  %5980 = vst [vmem:[#allocation49_spill] sm:$0xff] %v4490_v60  ;;  %v961_v50 = vrot.slane %v704_v6, 1  ;;  %v4527_v7 = vpop.permute.xlu0 %711 }
 0x13f   : > { %3288 = vrot.lane.b32.xlu0 %v3287_v4, %s3743_s21  ;;  %2991 = vmatpush3.bf16.msra.mxu1 %v2109_v18 }
 0x140   : > { %3298 = vrot.lane.b32.xlu1 %v3287_v4, %s3744_s22  ;;  %v703_v4 = vmax.f32 %v4216_v54, 0.0 }
 0x142   : > { %v955_v54 = vrot.slane %v703_v4, 7  ;;  %v960_v58 = vrot.slane %v703_v4, 1  ;;  %v4500_v18 = vpack.i.bf16 %v704_v6, %v703_v4  ;;  %v823_v4 = vrot.slane %v4371_v36, 7  ;;  %v4516_v6 = vpop.permute.xlu1 %3083 }
 0x143   : > { %3293 = vrot.lane.b32.xlu0 %v4161_v48, %s3745_s23 }
 0x144   : > { %3303 = vrot.lane.b32.xlu1 %v4161_v48, %s3746_s24  ;;  %v959_v14 = vsel %vm777_vm3, 0.0, %v955_v54  ;;  %v962_v42 = vsel %vm873_vm2, %v960_v58, %v961_v50 }
 0x147   : > { %3313 = vrot.lane.b32.xlu0 %v3312_v44, %s3743_s21 }
 0x148   : > { %3308 = vrot.lane.b32.xlu1 %v4161_v48, %s3740_s16  ;;  %v3337_v48 = vpack.i.bf16 %v4188_v56, %v4470_v45 }
 0x14b   : > { %3318 = vrot.lane.b32.xlu0 %v4176_v5, %s3745_s23 }
 0x14c   : > { %3323 = vrot.lane.b32.xlu1 %v3312_v44, %s3744_s22  ;;  %v957_v44 = vsel %vm777_vm3, %v955_v54, %v956_v63  ;;  %v3362_v63 = vpack.i.bf16 %v4203_v59, %v4490_v60  ;;  %v964_v54 = vsel %vm873_vm2, %v961_v50, 0.0 }
 0x14d   : > { %v4492_v61 = vpack.i.bf16 %v957_v44, %v959_v14  ;;  %v918_v44 = vrot.slane %v4369_v33, 1  ;;  %v4508_v14 = vpack.i.bf16 %v964_v54, %v962_v42  ;;  %v4523_v42 = vsel %vm777_vm3, %v5883_v49, %v823_v4 }
 0x14e   : > { %5981 = vst [vmem:[#allocation50_spill] sm:$0xff] %v4523_v42 }
 0x14f   : > { %3338 = vrot.lane.b32.xlu0 %v3337_v48, %s3744_s22 }
 0x150   : > { %3328 = vrot.lane.b32.xlu1 %v4176_v5, %s3746_s24 }
 0x153   : > { %3348 = vrot.lane.b32.xlu0 %v4198_v29, %s3740_s16 }
 0x154   : > { %3333 = vrot.lane.b32.xlu1 %v4176_v5, %s3740_s16  ;;  %v919_v5 = vrot.slane %v4371_v36, 1 }
 0x156   : > { %v920_v58 = vsel %vm873_vm2, %v918_v44, %v919_v5  ;;  %v952_v50 = vsel %vm873_vm2, %v919_v5, 0.0  ;;  %v5983_v5 = vpack.i.bf16 %v4236_v46, %v4090_v3 }
 0x157   : > { %3363 = vrot.lane.b32.xlu0 %v3362_v63, %s3744_s22  ;;  %v4525_v54 = vpack.i.bf16 %v952_v50, %v920_v58 }
 0x158   : > { %3343 = vrot.lane.b32.xlu1 %v4198_v29, %s3746_s24 }
 0x15b   : > { %3373 = vrot.lane.b32.xlu0 %v4256_v28, %s3740_s16 }
 0x15c   : > { %3353 = vrot.lane.b32.xlu1 %v3337_v48, %s3743_s21 }
 0x15f   : > { %3388 = vrot.lane.b32.xlu0 %v5982_v15, %s3738_s11 }
 0x160   : > { %3358 = vrot.lane.b32.xlu1 %v4198_v29, %s3745_s23 }
 0x161   : > { %v4535_v48 = vpop.permute.xlu0 %3088 }
 0x162   : > { %v4537_v44 = vpop.permute.xlu1 %3098 }
 0x163   : > { %3393 = vrot.lane.b32.xlu0 %v5983_v5, %s3738_s11  ;;  %v5988_v5 = vpack.i.bf16 %v4230_v12, %v4249_v13  ;;  %v5989_v13 = vrot.slane %v4230_v12, 7 }
 0x164   : > { %3368 = vrot.lane.b32.xlu1 %v4256_v28, %s3746_s24 }
 0x165   : > { %v4545_v4 = vpop.permute.xlu0 %3093 }
 0x166   : > { %v4547_v58 = vpop.permute.xlu1 %3108 }
 0x167   : > { %5984 = vst [vmem:[#allocation51_spill] sm:$0xff] %v4547_v58  ;;  %3398 = vrot.lane.b32.xlu0 %v4274_v19, %s3742_s20  ;;  %v3085_v58 = vunpack.i.l.bf16 %v4516_v6 }
 0x168   : > { %3378 = vrot.lane.b32.xlu1 %v3362_v63, %s3743_s21 }
 0x169   : > { %v4552_v29 = vpop.permute.xlu0 %3103 }
 0x16a   : > { %5985 = vst [vmem:[#allocation52_spill] sm:$0xff] %v4552_v29  ;;  %v4554_v41 = vpop.permute.xlu1 %3113 }
 0x16b   : > { %3408 = vrot.lane.b32.xlu0 %v4278_v23, %s3742_s20 }
 0x16c   : > { %3383 = vrot.lane.b32.xlu1 %v4256_v28, %s3745_s23 }
 0x16d   : > { %v4560_v3 = vpop.permute.xlu0 %3123 }
 0x16e   : > { %5986 = vst [vmem:[#allocation53_spill] sm:$0xff] %v4560_v3  ;;  %v4562_v15 = vpop.permute.xlu1 %3118 }
 0x16f   : > { %3418 = vrot.lane.b32.xlu0 %v4282_v10, %s3741_s19 }
 0x170   : > { %3403 = vrot.lane.b32.xlu1 %v4274_v19, %s3741_s19 }
 0x171   : > { %v4568_v63 = vpop.permute.xlu0 %3128 }
 0x172   : > { %v4570_v50 = vpop.permute.xlu1 %3133 }
 0x173   : > { %5987 = vst [vmem:[#allocation54_spill] sm:$0xff] %v4570_v50  ;;  %3423 = vrot.lane.b32.xlu0 %v5988_v5, %s3738_s11  ;;  %v4593_v5 = vsel %vm777_vm3, 0.0, %v5989_v13 }
 0x174   : > { %3413 = vrot.lane.b32.xlu1 %v4278_v23, %s3741_s19  ;;  %5990 = vst [vmem:[#allocation55_spill] sm:$0xff] %v4593_v5  ;;  %v5991_v23 = vpack.i.bf16 %v4252_v35, %v4258_v21  ;;  %v3447_v29 = vpack.i.bf16 %v4306_v55, %v4593_v5  ;;  %v5995_v21 = vrot.slane %v4252_v35, 7  ;;  %v3090_v35 = vunpack.i.l.bf16 %v4535_v48 }
 0x175   : > { %v4578_v28 = vpop.permute.xlu0 %3138 }
 0x176   : > { %v4580_v49 = vpop.permute.xlu1 %3148 }
 0x177   : > { %3433 = vrot.lane.b32.xlu0 %v4288_v39, %s3741_s19 }
 0x178   : > { %3428 = vrot.lane.b32.xlu1 %v4282_v10, %s3742_s20 }
 0x179   : > { %v4586_v19 = vpop.permute.xlu0 %3143 }
 0x17a   : > { %v4588_v50 = vpop.permute.xlu1 %3153 }
 0x17b   : > { %3438 = vrot.lane.b32.xlu0 %v5991_v23, %s3738_s11  ;;  %v4616_v23 = vsel %vm777_vm3, 0.0, %v5995_v21 }
 0x17c   : > { %3443 = vrot.lane.b32.xlu1 %v4288_v39, %s3742_s20  ;;  %5996 = vst [vmem:[#allocation59_spill] sm:$0xff] %v4616_v23  ;;  %v5997_v39 = vmov 0.0  }
 0x17d   : > { %v4601_v3 = vpop.permute.xlu0 %3163  ;;  %v4623_v5 = vrot.slane %v5997_v39, 7 }
 0x17e   : > { %5992 = vst [vmem:[#allocation56_spill] sm:$0xff] %v4601_v3  ;;  %v4603_v10 = vpop.permute.xlu1 %3158 }
 0x17f   : > { %3448 = vrot.lane.b32.xlu0 %v3447_v29, %s3743_s21  ;;  %v4637_v21 = vsel %vm777_vm3, 0.0, %v4623_v5 }
 0x180   : > { %3458 = vrot.lane.b32.xlu1 %v3447_v29, %s3744_s22 }
 0x181   : > { %v4609_v12 = vpop.permute.xlu0 %3168 }
 0x182   : > { %5993 = vst [vmem:[#allocation57_spill] sm:$0xff] %v4609_v12  ;;  %v4611_v13 = vpop.permute.xlu1 %3173 }
 0x183   : > { %5994 = vst [vmem:[#allocation58_spill] sm:$0xff] %v4611_v13  ;;  %3453 = vrot.lane.b32.xlu0 %v4312_v27, %s3745_s23  ;;  %v3472_v13 = vpack.i.bf16 %v4317_v24, %v4616_v23  ;;  %v1763_v23 = vsel %vm1761_vm4, %v4623_v5, %v3090_v35 }
 0x184   : > { %3463 = vrot.lane.b32.xlu1 %v4312_v27, %s3746_s24 }
 0x185   : > { %v4625_v55 = vpop.permute.xlu0 %3188 }
 0x186   : > { %v4627_v29 = vpop.permute.xlu1 %3178 }
 0x187   : > { %5998 = vst [vmem:[#allocation60_spill] sm:$0xff] %v4627_v29  ;;  %3473 = vrot.lane.b32.xlu0 %v3472_v13, %s3743_s21  ;;  %v6000_v29 = vrot.slane %v4233_v31, 7 }
 0x188   : > { %3468 = vrot.lane.b32.xlu1 %v4312_v27, %s3740_s16  ;;  %v1762_v27 = vsel %vm1761_vm4, %v4637_v21, %v3090_v35 }
 0x189   : > { %v4639_v12 = vpop.permute.xlu0 %3203  ;;  %v4646_v24 = vsel %vm777_vm3, 0.0, %v6000_v29 }
 0x18a   : > { %5999 = vst [vmem:[#allocation61_spill] sm:$0xff] %v4639_v12  ;;  %v4641_v3 = vpop.permute.xlu1 %3183  ;;  %6001 = vst [vmem:[#allocation62_spill] sm:$0xff] %v4646_v24  ;;  %v3086_v12 = vunpack.i.h.bf16 %v4516_v6  ;;  %v3487_v29 = vpack.i.bf16 %v4334_v57, %v4646_v24  ;;  %v3121_v57 = vunpack.i.h.bf16 %v4562_v15 }
 0x18b   : > { %3478 = vrot.lane.b32.xlu0 %v4329_v9, %s3745_s23 }
 0x18c   : > { %3483 = vrot.lane.b32.xlu1 %v3472_v13, %s3744_s22  ;;  %v1794_v13 = vsel %vm420_vm1, %v1762_v27, %v3085_v58  ;;  %v1795_v60 = vsel %vm420_vm1, %v1763_v23, %v3086_v12  ;;  %v6003_v12 = vrot.slane %v4236_v46, 7 }
 0x18d   : > { %v4657_v8 = vpop.permute.xlu0 %3213 }
 0x18e   : > { %6002 = vst [vmem:[#allocation63_spill] sm:$0xff] %v4657_v8  ;;  %v3194_v31 = vpop.permute.xlu1 %3193  ;;  %v4675_v23 = vsel %vm777_vm3, 0.0, %v6003_v12  ;;  %v3101_v12 = vunpack.i.h.bf16 %v4537_v44 }
 0x18f   : > { %v3196_v59 = vunpack.i.h.bf16 %v3194_v31  ;;  %v3195_v56 = vunpack.i.l.bf16 %v3194_v31  ;;  %3488 = vrot.lane.b32.xlu0 %v3487_v29, %s3744_s22  ;;  %v3120_v31 = vunpack.i.l.bf16 %v4562_v15 }
 0x190   : > { %3493 = vrot.lane.b32.xlu1 %v4351_v38, %s3746_s24 }
 0x191   : > { %v1828_v6 = vsel %vm1826_vm5, %v1795_v60, %v3196_v59  ;;  %v1827_v35 = vsel %vm1826_vm5, %v1794_v13, %v3195_v56  ;;  %v4670_v24 = vpop.permute.xlu0 %3228  ;;  %v3151_v56 = vunpack.i.h.bf16 %v4580_v49  ;;  %v3150_v59 = vunpack.i.l.bf16 %v4580_v49 }
 0x192   : > { %v3199_v58 = vpop.permute.xlu1 %3198  ;;  %v1860_v60 = vsel %vm1859_vm6, %v1827_v35, %v3120_v31  ;;  %v1861_v15 = vsel %vm1859_vm6, %v1828_v6, %v3121_v57  ;;  %v3100_v49 = vunpack.i.l.bf16 %v4537_v44 }
 0x193   : > { %v3201_v27 = vunpack.i.h.bf16 %v3199_v58  ;;  %v3200_v8 = vunpack.i.l.bf16 %v3199_v58  ;;  %3498 = vrot.lane.b32.xlu0 %v4351_v38, %s3740_s16  ;;  %v3512_v58 = vpack.i.bf16 %v4360_v1, %v4675_v23 }
 0x194   : > { %3503 = vrot.lane.b32.xlu1 %v3487_v29, %s3743_s21  ;;  %v3155_v29 = vunpack.i.l.bf16 %v4588_v50 }
 0x195   : > { %v1893_v46 = vsel %vm1892_vm7, %v1860_v60, %v3200_v8  ;;  %v1894_v13 = vsel %vm1892_vm7, %v1861_v15, %v3201_v27  ;;  %v4692_v6 = vpop.permute.xlu0 %3233  ;;  %v3156_v8 = vunpack.i.h.bf16 %v4588_v50 }
 0x196   : > { %v1926_v35 = vsel %vm1925_vm8, %v1893_v46, %v3150_v59  ;;  %v1927_v57 = vsel %vm1925_vm8, %v1894_v13, %v3151_v56  ;;  %v4694_v31 = vpop.permute.xlu1 %3208  ;;  %v6007_v13 = vpack.i.bf16 %v4341_v26, %v4239_v62  ;;  %v6008_v62 = vpack.i.bf16 %v3913_v51, %v4344_v0 }
 0x197   : > { %6004 = vst [vmem:[#allocation64_spill] sm:$0xff] %v4694_v31  ;;  %3513 = vrot.lane.b32.xlu0 %v3512_v58, %s3744_s22  ;;  %v1959_v27 = vsel %vm1958_vm9, %v1926_v35, %v3100_v49  ;;  %v1960_v44 = vsel %vm1958_vm9, %v1927_v57, %v3101_v12 }
 0x198   : > { %3508 = vrot.lane.b32.xlu1 %v4351_v38, %s3745_s23  ;;  %v1992_v59 = vsel %vm1991_vm10, %v1959_v27, %v3155_v29  ;;  %v1993_v56 = vsel %vm1991_vm10, %v1960_v44, %v3156_v8  ;;  %v6012_v27 = vpack.i.bf16 %v4338_v22, %v4355_v32  ;;  %v3115_v32 = vunpack.i.l.bf16 %v4554_v41 }
 0x199   : > { %v4705_v60 = vpop.permute.xlu0 %3238  ;;  %v2024_v46 = vpack.c.bf16 %v1993_v56, %v1992_v59 }
 0x19a   : > { %v4707_v15 = vpop.permute.xlu1 %3218 }
 0x19b   : > { %6005 = vst [vmem:[#allocation65_spill] sm:$0xff] %v4707_v15  ;;  %2992 = vmatprep.mubr.msk.bf16.mxu1 %vm2059_vm11, %v2024_v46  ;;  %3523 = vrot.lane.b32.xlu0 %v4383_v16, %s3740_s16 }
 0x19c   : > { %3518 = vrot.lane.b32.xlu1 %v4383_v16, %s3746_s24 }
 0x19d   : > { %v4714_v38 = vpop.permute.xlu0 %3248 }
 0x19e   : > { %v4716_v50 = vpop.permute.xlu1 %3223 }
 0x19f   : > { %6006 = vst [vmem:[#allocation66_spill] sm:$0xff] %v4716_v50  ;;  %3538 = vrot.lane.b32.xlu0 %v6007_v13, %s3738_s11  ;;  %v6050_v50 = vld [vmem:[#allocation40_spill] sm:$0xff] }
 0x1a0   : > { %3528 = vrot.lane.b32.xlu1 %v3512_v58, %s3743_s21 }
 0x1a1   : > { %v4723_v12 = vpop.permute.xlu0 %3258 }
 0x1a2   : > { %v4725_v49 = vpop.permute.xlu1 %3243 }
 0x1a3   : > { %3543 = vrot.lane.b32.xlu0 %v4379_v25, %s3742_s20 }
 0x1a4   : > { %3533 = vrot.lane.b32.xlu1 %v4383_v16, %s3745_s23  ;;  %v6010_v16 = vrot.slane %v4338_v22, 7  ;;  %v3091_v22 = vunpack.i.h.bf16 %v4535_v48 }
 0x1a5   : > { %v4731_v35 = vpop.permute.xlu0 %3263 }
 0x1a6   : > { %v4733_v57 = vpop.permute.xlu1 %3253  ;;  %v4750_v29 = vsel %vm777_vm3, 0.0, %v6010_v16  ;;  %v3190_v16 = vunpack.i.l.bf16 %v4625_v55  ;;  %v1764_v48 = vsel %vm1761_vm4, %v4212_v53, %v3091_v22 }
 0x1a7   : > { %3553 = vrot.lane.b32.xlu0 %v6008_v62, %s3738_s11  ;;  %6011 = vst [vmem:[#allocation68_spill] sm:$0xff] %v4750_v29  ;;  %v3191_v62 = vunpack.i.h.bf16 %v4625_v55 }
 0x1a8   : > { %3548 = vrot.lane.b32.xlu1 %v4379_v25, %s3741_s19  ;;  %v3587_v25 = vpack.i.bf16 %v4410_v30, %v4750_v29  ;;  %v3141_v29 = vunpack.i.h.bf16 %v4578_v28  ;;  %v3140_v30 = vunpack.i.l.bf16 %v4578_v28 }
 0x1a9   : > { %v4741_v58 = vpop.permute.xlu0 %3273 }
 0x1aa   : > { %6009 = vst [vmem:[#allocation67_spill] sm:$0xff] %v4741_v58  ;;  %v4743_v8 = vpop.permute.xlu1 %3268 }
 0x1ab   : > { %3558 = vrot.lane.b32.xlu0 %v4387_v34, %s3741_s19 }
 0x1ac   : > { %3568 = vrot.lane.b32.xlu1 %v4387_v34, %s3742_s20 }
 0x1ad   : > { %v4754_v51 = vpop.permute.xlu0 %3278 }
 0x1ae   : > { %v4756_v0 = vpop.permute.xlu1 %3283 }
 0x1af   : > { %3563 = vrot.lane.b32.xlu0 %v6012_v27, %s3738_s11  ;;  %v6013_v27 = vrot.slane %v4341_v26, 7 }
 0x1b0   : > { %3588 = vrot.lane.b32.xlu1 %v3587_v25, %s3744_s22 }
 0x1b1   : > { %v4765_v44 = vpop.permute.xlu0 %3288  ;;  %v4791_v58 = vsel %vm777_vm3, 0.0, %v6013_v27  ;;  %v1796_v27 = vsel %vm420_vm1, %v1764_v48, %v3190_v16  ;;  %v3095_v16 = vunpack.i.l.bf16 %v4545_v4 }
 0x1b2   : > { %v4767_v59 = vpop.permute.xlu1 %3298  ;;  %6014 = vst [vmem:[#allocation69_spill] sm:$0xff] %v4791_v58  ;;  %v3602_v26 = vpack.i.bf16 %v4446_v37, %v4791_v58  ;;  %v3096_v37 = vunpack.i.h.bf16 %v4545_v4 }
 0x1b3   : > { %3573 = vrot.lane.b32.xlu0 %v4401_v47, %s3741_s19 }
 0x1b4   : > { %3593 = vrot.lane.b32.xlu1 %v4414_v40, %s3746_s24 }
 0x1b5   : > { %v4773_v34 = vpop.permute.xlu0 %3293 }
 0x1b6   : > { %v4775_v56 = vpop.permute.xlu1 %3303 }
 0x1b7   : > { %3578 = vrot.lane.b32.xlu0 %v3587_v25, %s3743_s21  ;;  %v1765_v25 = vsel %vm1761_vm4, %v4114_v43, %v3115_v32  ;;  %v1829_v43 = vsel %vm1826_vm5, %v1796_v27, %v3140_v30  ;;  %v3146_v30 = vunpack.i.h.bf16 %v4586_v19 }
 0x1b8   : > { %3598 = vrot.lane.b32.xlu1 %v4414_v40, %s3740_s16  ;;  %v1862_v28 = vsel %vm1859_vm6, %v1829_v43, %v3095_v16  ;;  %v3230_v43 = vunpack.i.l.bf16 %v4670_v24 }
 0x1b9   : > { %v4782_v46 = vpop.permute.xlu0 %3313 }
 0x1ba   : > { %v4784_v13 = vpop.permute.xlu1 %3308 }
 0x1bb   : > { %3583 = vrot.lane.b32.xlu0 %v4414_v40, %s3745_s23  ;;  %v1797_v40 = vsel %vm420_vm1, %v1765_v25, %v3191_v62 }
 0x1bc   : > { %3608 = vrot.lane.b32.xlu1 %v4441_v52, %s3746_s24  ;;  %v1830_v53 = vsel %vm1826_vm5, %v1797_v40, %v3141_v29  ;;  %v3145_v29 = vunpack.i.l.bf16 %v4586_v19  ;;  %v3261_v19 = vunpack.i.h.bf16 %v4723_v12 }
 0x1bd   : > { %v4801_v31 = vpop.permute.xlu0 %3318  ;;  %v1863_v62 = vsel %vm1859_vm6, %v1830_v53, %v3096_v37  ;;  %v6015_v37 = vpack.i.bf16 %v4369_v33, %v4254_v17 }
 0x1be   : > { %v4803_v55 = vpop.permute.xlu1 %3323  ;;  %v1895_v4 = vsel %vm1892_vm7, %v1862_v28, %v3145_v29  ;;  %v1896_v40 = vsel %vm1892_vm7, %v1863_v62, %v3146_v30  ;;  %v3116_v62 = vunpack.i.h.bf16 %v4554_v41  ;;  %v3160_v29 = vunpack.i.l.bf16 %v4603_v10 }
 0x1bf   : > { %3603 = vrot.lane.b32.xlu0 %v3602_v26, %s3744_s22  ;;  %v3161_v41 = vunpack.i.h.bf16 %v4603_v10 }
 0x1c0   : > { %3618 = vrot.lane.b32.xlu1 %v3602_v26, %s3743_s21 }
 0x1c1   : > { %v3339_v22 = vpop.permute.xlu0 %3338 }
 0x1c2   : > { %v4815_v32 = vpop.permute.xlu1 %3328  ;;  %v3341_v48 = vunpack.i.h.bf16 %v3339_v22  ;;  %v3340_v25 = vunpack.i.l.bf16 %v3339_v22  ;;  %v3260_v22 = vunpack.i.l.bf16 %v4723_v12 }
 0x1c3   : > { %3613 = vrot.lane.b32.xlu0 %v4441_v52, %s3740_s16 }
 0x1c4   : > { %3623 = vrot.lane.b32.xlu1 %v4441_v52, %s3745_s23  ;;  %v1929_v52 = vsel %vm1925_vm8, %v1896_v40, %v3341_v48  ;;  %v1928_v53 = vsel %vm1925_vm8, %v1895_v4, %v3340_v25  ;;  %v1767_v4 = vsel %vm1761_vm4, %v3948_v2, %v3230_v43 }
 0x1c5   : > { %v4827_v26 = vpop.permute.xlu0 %3348  ;;  %v1961_v48 = vsel %vm1958_vm9, %v1928_v53, %v3260_v22  ;;  %v1962_v25 = vsel %vm1958_vm9, %v1929_v52, %v3261_v19  ;;  %v1766_v52 = vsel %vm1761_vm4, %v4030_v11, %v3116_v62  ;;  %v1799_v43 = vsel %vm420_vm1, %v1767_v4, %v3161_v41 }
 0x1c6   : > { %v4829_v27 = vpop.permute.xlu1 %3333  ;;  %v1798_v2 = vsel %vm420_vm1, %v1766_v52, %v3160_v29  ;;  %v3271_v11 = vunpack.i.h.bf16 %v4743_v8  ;;  %v3270_v22 = vunpack.i.l.bf16 %v4743_v8  ;;  %v3246_v41 = vunpack.i.h.bf16 %v4725_v49 }
 0x1c7   : > { %3633 = vrot.lane.b32.xlu0 %v6015_v37, %s3738_s11 }
 0x1c8   : > { %3628 = vrot.lane.b32.xlu1 %v4329_v9, %s3746_s24 }
 0x1c9   : > { %v4844_v16 = vpop.permute.xlu0 %3363 }
 0x1ca   : > { %6016 = vst [vmem:[#allocation70_spill] sm:$0xff] %v4844_v16  ;;  %v3344_v28 = vpop.permute.xlu1 %3343 }
 0x1cb   : > { %v3346_v17 = vunpack.i.h.bf16 %v3344_v28  ;;  %v3345_v30 = vunpack.i.l.bf16 %v3344_v28  ;;  %1025 = vrot.lane.b32.xlu0 %v4371_v36, %s3738_s11 }
 0x1cc   : > { %3638 = vrot.lane.b32.xlu1 %v4329_v9, %s3740_s16 }
 0x1cd   : > { %v1994_v12 = vsel %vm1991_vm10, %v1961_v48, %v3345_v30  ;;  %v1995_v40 = vsel %vm1991_vm10, %v1962_v25, %v3346_v17  ;;  %v4859_v28 = vpop.permute.xlu0 %3373  ;;  %v3301_v48 = vunpack.i.h.bf16 %v4767_v59  ;;  %v3300_v25 = vunpack.i.l.bf16 %v4767_v59 }
 0x1ce   : > { %v2025_v37 = vpack.c.bf16 %v1995_v40, %v1994_v12  ;;  %v3354_v53 = vpop.permute.xlu1 %3353  ;;  %v3245_v59 = vunpack.i.l.bf16 %v4725_v49 }
 0x1cf   : > { %v3356_v36 = vunpack.i.h.bf16 %v3354_v53  ;;  %v3355_v19 = vunpack.i.l.bf16 %v3354_v53  ;;  %3643 = vrot.lane.b32.xlu0 %v4492_v61, %s3743_s21 }
 0x1d0   : > { %2993 = vmatmul.mubr.msk.bf16.vlgmr.msra.gmra.mrb[16].mxu1 %vm2059_vm11, %v2025_v37  ;;  %3648 = vrot.lane.b32.xlu1 %v4401_v47, %s3742_s20  ;;  %v3235_v47 = vunpack.i.l.bf16 %v4692_v6 }
 0x1d1   : > { %v1832_v9 = vsel %vm1826_vm5, %v1799_v43, %v3356_v36  ;;  %v1831_v10 = vsel %vm1826_vm5, %v1798_v2, %v3355_v19  ;;  %v4874_v62 = vpop.permute.xlu0 %3388  ;;  %v3131_v19 = vunpack.i.h.bf16 %v4568_v63  ;;  %v3305_v2 = vunpack.i.l.bf16 %v4775_v56 }
 0x1d2   : > { %v3359_v17 = vpop.permute.xlu1 %3358  ;;  %v1864_v4 = vsel %vm1859_vm6, %v1831_v10, %v3270_v22  ;;  %v1865_v12 = vsel %vm1859_vm6, %v1832_v9, %v3271_v11  ;;  %v3667_v43 = vpack.i.bf16 %v4623_v5, %v4637_v21  ;;  %v3306_v9 = vunpack.i.h.bf16 %v4775_v56 }
 0x1d3   : > { %v3361_v30 = vunpack.i.h.bf16 %v3359_v17  ;;  %v3360_v29 = vunpack.i.l.bf16 %v3359_v17  ;;  %3653 = vrot.lane.b32.xlu0 %v4500_v18, %s3742_s20  ;;  %v1783_v11 = vsel %vm1761_vm4, %v3987_v20, %v3235_v47  ;;  %v3186_v5 = vunpack.i.h.bf16 %v4641_v3 }
 0x1d4   : > { %3663 = vrot.lane.b32.xlu1 %v4492_v61, %s3744_s22  ;;  %v3185_v61 = vunpack.i.l.bf16 %v4641_v3 }
 0x1d5   : > { %v1897_v8 = vsel %vm1892_vm7, %v1864_v4, %v3360_v29  ;;  %v1898_v40 = vsel %vm1892_vm7, %v1865_v12, %v3361_v30  ;;  %v4891_v52 = vpop.permute.xlu0 %3393  ;;  %v6019_v30 = vld [vmem:[#allocation36_spill] sm:$0xff]  ;;  %v6020_v4 = vrot.slane %v4369_v33, 7  ;;  %v1815_v12 = vsel %vm420_vm1, %v1783_v11, %v3186_v5 }
 0x1d6   : > { %v1930_v37 = vsel %vm1925_vm8, %v1897_v8, %v3300_v25  ;;  %v1931_v53 = vsel %vm1925_vm8, %v1898_v40, %v3301_v48  ;;  %v4893_v36 = vpop.permute.xlu1 %3368  ;;  %v1782_v29 = vsel %vm1761_vm4, %v6019_v30, %v3131_v19  ;;  %v3286_v40 = vunpack.i.h.bf16 %v4756_v0 }
 0x1d7   : > { %6017 = vst [vmem:[#allocation71_spill] sm:$0xff] %v4893_v36  ;;  %3658 = vrot.lane.b32.xlu0 %v4508_v14, %s3745_s23  ;;  %v1963_v49 = vsel %vm1958_vm9, %v1930_v37, %v3245_v59  ;;  %v1964_v10 = vsel %vm1958_vm9, %v1931_v53, %v3246_v41  ;;  %v4919_v20 = vsel %vm777_vm3, 0.0, %v6020_v4  ;;  %v3285_v33 = vunpack.i.l.bf16 %v4756_v0 }
 0x1d8   : > { %3673 = vrot.lane.b32.xlu1 %v4500_v18, %s3741_s19  ;;  %v1996_v22 = vsel %vm1991_vm10, %v1963_v49, %v3305_v2  ;;  %v1997_v17 = vsel %vm1991_vm10, %v1964_v10, %v3306_v9  ;;  %6021 = vst [vmem:[#allocation36_spill] sm:$0xff] %v4919_v20  ;;  %v1814_v18 = vsel %vm420_vm1, %v1782_v29, %v3185_v61  ;;  %v3326_v2 = vunpack.i.h.bf16 %v4803_v55 }
 0x1d9   : > { %v4911_v21 = vpop.permute.xlu0 %3398  ;;  %v2026_v3 = vpack.c.bf16 %v1997_v17, %v1996_v22  ;;  %v3677_v37 = vpack.i.bf16 %v4523_v42, %v4919_v20  ;;  %v3256_v10 = vunpack.i.h.bf16 %v4733_v57  ;;  %v3255_v11 = vunpack.i.l.bf16 %v4733_v57  ;;  %v6043_v42 = vld [vmem:[#allocation24_spill] sm:$0xff] }
 0x1da   : > { %6018 = vst [vmem:[#allocation72_spill] sm:$0xff] %v4911_v21  ;;  %v3379_v56 = vpop.permute.xlu1 %3378  ;;  %v3331_v17 = vunpack.i.h.bf16 %v4815_v32  ;;  %v3330_v30 = vunpack.i.l.bf16 %v4815_v32  ;;  %v6051_v21 = vld [vmem:[#allocation41_spill] sm:$0xff] }
 0x1db   : > { %v3381_v48 = vunpack.i.h.bf16 %v3379_v56  ;;  %v3380_v25 = vunpack.i.l.bf16 %v3379_v56  ;;  %3668 = vrot.lane.b32.xlu0 %v3667_v43, %s3744_s22  ;;  %2996 = vmatprep.mubr.msk.bf16.mxu1 %vm2059_vm11, %v2026_v3  ;;  %v3325_v43 = vunpack.i.l.bf16 %v4803_v55  ;;  %v6024_v3 = vld [vmem:[#allocation4_spill] sm:$0xff] }
 0x1dc   : > { %3683 = vrot.lane.b32.xlu1 %v4525_v54, %s3746_s24 }
 0x1dd   : > { %v1848_v47 = vsel %vm1826_vm5, %v1815_v12, %v3381_v48  ;;  %v1847_v8 = vsel %vm1826_vm5, %v1814_v18, %v3380_v25  ;;  %v4931_v41 = vpop.permute.xlu0 %3408 }
 0x1de   : > { %v3384_v59 = vpop.permute.xlu1 %3383  ;;  %v1880_v61 = vsel %vm1859_vm6, %v1847_v8, %v3285_v33  ;;  %v1881_v9 = vsel %vm1859_vm6, %v1848_v47, %v3286_v40  ;;  %v714_v47 = vadd.f32 %v4527_v7, %v6024_v3  ;;  %v6025_v8 = vld [vmem:[#allocation2_spill] sm:$0xff]  ;;  %v6026_v40 = vld [vmem:[#allocation8_spill] sm:$0xff]  ;;  %v6036_v3 = vld [vmem:[#allocation13_spill] sm:$0xff] }
 0x1df   : > { %v3386_v53 = vunpack.i.h.bf16 %v3384_v59  ;;  %v3385_v19 = vunpack.i.l.bf16 %v3384_v59  ;;  %3678 = vrot.lane.b32.xlu0 %v3677_v37, %s3744_s22  ;;  %v715_v33 = vadd.f32 %v4527_v7, %v6026_v40 }
 0x1e0   : > { %3693 = vrot.lane.b32.xlu1 %v3677_v37, %s3743_s21 }
 0x1e1   : > { %v1913_v0 = vsel %vm1892_vm7, %v1880_v61, %v3385_v19  ;;  %v1914_v49 = vsel %vm1892_vm7, %v1881_v9, %v3386_v53  ;;  %v4947_v5 = vpop.permute.xlu0 %3418  ;;  %v6028_v53 = vld [vmem:[#allocation5_spill] sm:$0xff]  ;;  %v6030_v61 = vld [vmem:[#allocation7_spill] sm:$0xff] }
 0x1e2   : > { %v1946_v22 = vsel %vm1925_vm8, %v1913_v0, %v3325_v43  ;;  %v1947_v55 = vsel %vm1925_vm8, %v1914_v49, %v3326_v2  ;;  %v4949_v56 = vpop.permute.xlu1 %3403  ;;  %v4994_v19 = vadd.f32 %v6028_v53, %v4527_v7  ;;  %v6029_v2 = vld [vmem:[#allocation6_spill] sm:$0xff]  ;;  %v5001_v9 = vadd.f32 %v4527_v7, %v6030_v61  ;;  %v6031_v0 = vld [vmem:[#allocation9_spill] sm:$0xff] }
 0x1e3   : > { %3688 = vrot.lane.b32.xlu0 %v4525_v54, %s3740_s16  ;;  %v1979_v29 = vsel %vm1958_vm9, %v1946_v22, %v3255_v11  ;;  %v1980_v48 = vsel %vm1958_vm9, %v1947_v55, %v3256_v10  ;;  %v717_v43 = vadd.f32 %v6029_v2, %v4527_v7  ;;  %v5005_v49 = vadd.f32 %v6031_v0, %v4527_v7  ;;  %v6032_v10 = vld [vmem:[#allocation10_spill] sm:$0xff]  ;;  %v6033_v22 = vld [vmem:[#allocation12_spill] sm:$0xff]  ;;  %v6040_v0 = vld [vmem:[#allocation19_spill] sm:$0xff]  ;;  %s2901_s16 = sshll.u32 %s6115_s28, 8 }
 0x1e4   : > { %3698 = vrot.lane.b32.xlu1 %v4525_v54, %s3745_s23  ;;  %v4960_v57 = vsel %vm1991_vm10, %v1979_v29, %v3330_v30  ;;  %v4963_v25 = vsel %vm1991_vm10, %v1980_v48, %v3331_v17  ;;  %v5009_v11 = vadd.f32 %v4527_v7, %v6032_v10  ;;  %v5014_v55 = vadd.f32 %v6033_v22, %v4527_v7  ;;  %v6034_v17 = vld [vmem:[#allocation11_spill] sm:$0xff]  ;;  %v6035_v29 = vld [vmem:[#allocation14_spill] sm:$0xff] }
 0x1e5   : > { %6022 = vst [vmem:[#allocation73_spill] sm:$0xff] %v4960_v57  ;;  %6023 = vst [vmem:[#allocation74_spill] sm:$0xff] %v4963_v25  ;;  %v4965_v4 = vpop.permute.xlu0 %3423  ;;  %v720_v30 = vadd.f32 %v6034_v17, %v4527_v7  ;;  %v5020_v48 = vadd.f32 %v4527_v7, %v6035_v29  ;;  %v3231_v2 = vunpack.i.h.bf16 %v4670_v24  ;;  %v3236_v61 = vunpack.i.h.bf16 %v4692_v6 }
 0x1e6   : > { %v4967_v18 = vpop.permute.xlu1 %3413  ;;  %v5036_v10 = vadd.f32 %v6040_v0, %v4527_v7  ;;  %v3265_v22 = vunpack.i.l.bf16 %v4731_v35  ;;  %v3280_v17 = vunpack.i.l.bf16 %v4754_v51  ;;  %v3350_v29 = vunpack.i.l.bf16 %v4827_v26  ;;  %v6042_v0 = vld [vmem:[#allocation22_spill] sm:$0xff] }
 0x1e7   : > { %1632 = vrot.lane.b32.xlu0 %v5997_v39, %s3741_s19  ;;  %v3376_v24 = vunpack.i.h.bf16 %v4859_v28  ;;  %v3375_v6 = vunpack.i.l.bf16 %v4859_v28  ;;  %v5050_v32 = vadd.f32 %v6042_v0, %v4527_v7  ;;  %v723_v57 = vadd.f32 %v4527_v7, %v6043_v42  ;;  %v6048_v0 = vld [vmem:[#allocation30_spill] sm:$0xff]  ;;  %s5725_s19 = scalar_lea.vmem %s5831_s8, %s2901_s16 }
 0x1e8   : > { %3703 = vrot.lane.b32.xlu1 %v4508_v14, %s3746_s24  ;;  %v6027_v14 = vld [vmem:[#allocation3_spill] sm:$0xff]  ;;  %v5072_v16 = vadd.f32 %v6048_v0, %v4527_v7  ;;  %v1768_v42 = vsel %vm1761_vm4, %v4470_v45, %v3231_v2  ;;  %v1785_v15 = vsel %vm1761_vm4, %v6051_v21, %v3280_v17  ;;  %v3290_v0 = vunpack.i.l.bf16 %v4765_v44 }
 0x1e9   : > { %v4975_v54 = vpop.permute.xlu0 %3433  ;;  %v716_v37 = vadd.f32 %v6027_v14, %v4527_v7  ;;  %v1817_v45 = vsel %vm420_vm1, %v1785_v15, %v3376_v24  ;;  %v3291_v21 = vunpack.i.h.bf16 %v4765_v44  ;;  %v3241_v15 = vunpack.i.h.bf16 %v4705_v60 }
 0x1ea   : > { %v4977_v12 = vpop.permute.xlu1 %3428  ;;  %v3250_v24 = vunpack.i.l.bf16 %v4714_v38 }
 0x1eb   : > { %3708 = vrot.lane.b32.xlu0 %v6025_v8, %s3746_s24 }
 0x1ec   : > { %2572 = vrot.lane.b32.xlu1 %v714_v47, %s3747_s9  ;;  %v718_v47 = vadd.f32 %v4527_v7, %v6036_v3  ;;  %v6041_v3 = vld [vmem:[#allocation20_spill] sm:$0xff] }
 0x1ed   : > { %v4986_v39 = vpop.permute.xlu0 %3438 }
 0x1ee   : > { %v4988_v59 = vpop.permute.xlu1 %3443 }
 0x1ef   : > { %2574 = vrot.lane.b32.xlu0 %v715_v33, %s3747_s9  ;;  %v6038_v33 = vld [vmem:[#allocation15_spill] sm:$0xff] }
 0x1f0   : > { %2576 = vrot.lane.b32.xlu1 %v716_v37, %s3747_s9  ;;  %v721_v14 = vadd.f32 %v6038_v33, %v4527_v7  ;;  %v6039_v37 = vld [vmem:[#allocation16_spill] sm:$0xff]  ;;  %v722_v33 = vadd.f32 %v4527_v7, %v6041_v3  ;;  %v6045_v3 = vld [vmem:[#allocation17_spill] sm:$0xff] }
 0x1f1   : > { %v5024_v8 = vpop.permute.xlu0 %3448  ;;  %v719_v53 = vadd.f32 %v4527_v7, %v6039_v37  ;;  %v3351_v37 = vunpack.i.h.bf16 %v4827_v26  ;;  %v5060_v26 = vadd.f32 %v6045_v3, %v4527_v7  ;;  %v3266_v3 = vunpack.i.h.bf16 %v4731_v35  ;;  %v6052_v35 = vld [vmem:[#allocation33_spill] sm:$0xff] }
 0x1f2   : > { %6037 = vst [vmem:[#allocation4_spill] sm:$0xff] %v5024_v8  ;;  %v5026_v40 = vpop.permute.xlu1 %3458 }
 0x1f3   : > { %2578 = vrot.lane.b32.xlu0 %v717_v43, %s3747_s9  ;;  %v6044_v43 = vld [vmem:[#allocation27_spill] sm:$0xff] }
 0x1f4   : > { %2580 = vrot.lane.b32.xlu1 %v718_v47, %s3747_s9  ;;  %v5056_v25 = vadd.f32 %v6044_v43, %v4527_v7  ;;  %v6047_v47 = vld [vmem:[#allocation28_spill] sm:$0xff]  ;;  %v6049_v43 = vld [vmem:[#allocation49_spill] sm:$0xff] }
 0x1f5   : > { %v5062_v20 = vpop.permute.xlu0 %3453  ;;  %v5068_v36 = vadd.f32 %v4527_v7, %v6047_v47  ;;  %v1784_v58 = vsel %vm1761_vm4, %v6049_v43, %v3236_v61  ;;  %v1800_v47 = vsel %vm420_vm1, %v1768_v42, %v3350_v29  ;;  %v3316_v61 = vunpack.i.h.bf16 %v4782_v46 }
 0x1f6   : > { %6046 = vst [vmem:[#allocation2_spill] sm:$0xff] %v5062_v20  ;;  %v5064_v28 = vpop.permute.xlu1 %3463  ;;  %v1769_v20 = vsel %vm1761_vm4, %v6050_v50, %v3265_v22  ;;  %v1816_v2 = vsel %vm420_vm1, %v1784_v58, %v3375_v6  ;;  %v5092_v50 = vadd.f32 %v4527_v7, %v6052_v35  ;;  %v3240_v58 = vunpack.i.l.bf16 %v4705_v60  ;;  %v6053_v6 = vld [vmem:[#allocation46_spill] sm:$0xff] }
 0x1f7   : > { %2582 = vrot.lane.b32.xlu0 %v719_v53, %s3747_s9  ;;  %v1801_v8 = vsel %vm420_vm1, %v1769_v20, %v3351_v37  ;;  %v3315_v53 = vunpack.i.l.bf16 %v4782_v46  ;;  %v1833_v20 = vsel %vm1826_vm5, %v1800_v47, %v3290_v0  ;;  %v3251_v29 = vunpack.i.h.bf16 %v4714_v38 }
 0x1f8   : > { %2584 = vrot.lane.b32.xlu1 %v720_v30, %s3747_s9  ;;  %v3390_v30 = vunpack.i.l.bf16 %v4874_v62  ;;  %v1834_v44 = vsel %vm1826_vm5, %v1801_v8, %v3291_v21  ;;  %v1850_v37 = vsel %vm1826_vm5, %v1817_v45, %v3316_v61  ;;  %v1770_v42 = vsel %vm1761_vm4, %v6053_v6, %v3266_v3 }
 0x1f9   : > { %v5097_v22 = vpop.permute.xlu0 %3473  ;;  %v1849_v46 = vsel %vm1826_vm5, %v1816_v2, %v3315_v53  ;;  %v3281_v60 = vunpack.i.h.bf16 %v4754_v51  ;;  %v3310_v43 = vunpack.i.l.bf16 %v4784_v13  ;;  %v3296_v47 = vunpack.i.h.bf16 %v4773_v34  ;;  %v6054_v2 = vld [vmem:[#allocation37_spill] sm:$0xff]  ;;  %v6055_v53 = vld [vmem:[#allocation48_spill] sm:$0xff] }
 0x1fa   : > { %v5099_v17 = vpop.permute.xlu1 %3468  ;;  %v3295_v8 = vunpack.i.l.bf16 %v4773_v34  ;;  %v3311_v0 = vunpack.i.h.bf16 %v4784_v13  ;;  %v1866_v38 = vsel %vm1859_vm6, %v1833_v20, %v3240_v58  ;;  %v1771_v3 = vsel %vm1761_vm4, %v6054_v2, %v3390_v30 }
 0x1fb   : > { %2586 = vrot.lane.b32.xlu0 %v721_v14, %s3747_s9  ;;  %v1867_v51 = vsel %vm1859_vm6, %v1834_v44, %v3241_v15  ;;  %v1882_v35 = vsel %vm1859_vm6, %v1849_v46, %v3250_v24  ;;  %v3321_v21 = vunpack.i.h.bf16 %v4801_v31  ;;  %v3320_v34 = vunpack.i.l.bf16 %v4801_v31 }
 0x1fc   : > { %2588 = vrot.lane.b32.xlu1 %v722_v33, %s3747_s9  ;;  %v1883_v33 = vsel %vm1859_vm6, %v1850_v37, %v3251_v29  ;;  %v3396_v13 = vunpack.i.h.bf16 %v4891_v52  ;;  %v3395_v61 = vunpack.i.l.bf16 %v4891_v52  ;;  %v5136_v58 = vsel %vm1761_vm4, %v6055_v53, %v3281_v60 }
 0x1fd   : > { %v5119_v45 = vpop.permute.xlu0 %3478  ;;  %v1802_v15 = vsel %vm420_vm1, %v1770_v42, %v3310_v43  ;;  %v3335_v20 = vunpack.i.l.bf16 %v4829_v27  ;;  %v1899_v30 = vsel %vm1892_vm7, %v1866_v38, %v3295_v8  ;;  %v1900_v31 = vsel %vm1892_vm7, %v1867_v51, %v3296_v47 }
 0x1fe   : > { %v5121_v14 = vpop.permute.xlu1 %3483  ;;  %v1803_v52 = vsel %vm420_vm1, %v1771_v3, %v3311_v0  ;;  %v1916_v37 = vsel %vm1892_vm7, %v1883_v33, %v3321_v21  ;;  %v5149_v60 = vsel %vm1761_vm4, %v4675_v23, %v3396_v13  ;;  %v3421_v47 = vunpack.i.h.bf16 %v4947_v5 }
 0x1ff   : > { %2590 = vrot.lane.b32.xlu0 %v723_v57, %s3747_s9  ;;  %v1915_v57 = vsel %vm1892_vm7, %v1882_v35, %v3320_v34  ;;  %v3420_v8 = vunpack.i.l.bf16 %v4947_v5  ;;  %v3411_v0 = vunpack.i.h.bf16 %v4931_v41  ;;  %v3440_v38 = vunpack.i.l.bf16 %v4986_v39 }
 0x200   : > { %2592 = vrot.lane.b32.xlu1 %v5036_v10, %s3747_s9  ;;  %v6056_v10 = vld [vmem:[#allocation38_spill] sm:$0xff]  ;;  %v3406_v3 = vunpack.i.h.bf16 %v4949_v56  ;;  %v3405_v51 = vunpack.i.l.bf16 %v4949_v56  ;;  %v3436_v21 = vunpack.i.h.bf16 %v4975_v54  ;;  %v3435_v34 = vunpack.i.l.bf16 %v4975_v54 }
 0x201   : > { %v3489_v29 = vpop.permute.xlu0 %3488  ;;  %v5153_v43 = vsel %vm1761_vm4, %v6056_v10, %v3395_v61  ;;  %v3460_v54 = vunpack.i.l.bf16 %v5026_v40 }
 0x202   : > { %v3494_v44 = vpop.permute.xlu1 %3493  ;;  %v3491_v46 = vunpack.i.h.bf16 %v3489_v29  ;;  %v3490_v24 = vunpack.i.l.bf16 %v3489_v29  ;;  %v1789_v29 = vsel %vm1761_vm4, %v4360_v1, %v3440_v38 }
 0x203   : > { %v3496_v6 = vunpack.i.h.bf16 %v3494_v44  ;;  %v3495_v42 = vunpack.i.l.bf16 %v3494_v44  ;;  %2594 = vrot.lane.b32.xlu0 %v5050_v32, %s3747_s9  ;;  %v3461_v44 = vunpack.i.h.bf16 %v5026_v40  ;;  %v3476_v40 = vunpack.i.h.bf16 %v5097_v22 }
 0x204   : > { %v1933_v2 = vsel %vm1925_vm8, %v1900_v31, %v3491_v46  ;;  %v1932_v23 = vsel %vm1925_vm8, %v1899_v30, %v3490_v24  ;;  %2596 = vrot.lane.b32.xlu1 %v5068_v36, %s3747_s9  ;;  %v3431_v36 = vunpack.i.h.bf16 %v4977_v12  ;;  %v3430_v31 = vunpack.i.l.bf16 %v4977_v12 }
 0x205   : > { %v1965_v5 = vsel %vm1958_vm9, %v1932_v23, %v3420_v8  ;;  %v1966_v35 = vsel %vm1958_vm9, %v1933_v2, %v3421_v47  ;;  %v5169_v32 = vpop.permute.xlu0 %3498  ;;  %v3466_v46 = vunpack.i.h.bf16 %v5064_v28  ;;  %v3465_v24 = vunpack.i.l.bf16 %v5064_v28 }
 0x206   : > { %v3504_v33 = vpop.permute.xlu1 %3503  ;;  %v1998_v13 = vsel %vm1991_vm10, %v1965_v5, %v3495_v42  ;;  %v1999_v61 = vsel %vm1991_vm10, %v1966_v35, %v3496_v6 }
 0x207   : > { %v2027_v53 = vpack.c.bf16 %v1999_v61, %v1998_v13  ;;  %v3506_v30 = vunpack.i.h.bf16 %v3504_v33  ;;  %v3505_v56 = vunpack.i.l.bf16 %v3504_v33  ;;  %2598 = vrot.lane.b32.xlu0 %v5092_v50, %s3747_s9 }
 0x208   : > { %2600 = vrot.lane.b32.xlu1 %v5056_v25, %s3747_s9  ;;  %v3475_v25 = vunpack.i.l.bf16 %v5097_v22 }
 0x209   : > { %v1836_v6 = vsel %vm1826_vm5, %v1803_v52, %v3506_v30  ;;  %v1835_v50 = vsel %vm1826_vm5, %v1802_v15, %v3505_v56  ;;  %v3514_v42 = vpop.permute.xlu0 %3513  ;;  %2997 = vmatmul.mubr.msk.bf16.gmra.mrb[20].mxu1 %vm2059_vm11, %v2027_v53 }
 0x20a   : > { %v3509_v12 = vpop.permute.xlu1 %3508  ;;  %v3516_v1 = vunpack.i.h.bf16 %v3514_v42  ;;  %v3515_v10 = vunpack.i.l.bf16 %v3514_v42  ;;  %v1868_v38 = vsel %vm1859_vm6, %v1835_v50, %v3430_v31  ;;  %v1869_v28 = vsel %vm1859_vm6, %v1836_v6, %v3431_v36 }
 0x20b   : > { %v3511_v47 = vunpack.i.h.bf16 %v3509_v12  ;;  %v3510_v8 = vunpack.i.l.bf16 %v3509_v12  ;;  %2602 = vrot.lane.b32.xlu0 %v5072_v16, %s3747_s9 }
 0x20c   : > { %v1949_v15 = vsel %vm1925_vm8, %v1916_v37, %v3516_v1  ;;  %v1948_v52 = vsel %vm1925_vm8, %v1915_v57, %v3515_v10  ;;  %2604 = vrot.lane.b32.xlu1 %v5001_v9, %s3747_s9 }
 0x20d   : > { %v1901_v2 = vsel %vm1892_vm7, %v1868_v38, %v3510_v8  ;;  %v1902_v23 = vsel %vm1892_vm7, %v1869_v28, %v3511_v47  ;;  %v3524_v35 = vpop.permute.xlu0 %3523  ;;  %v1981_v33 = vsel %vm1958_vm9, %v1948_v52, %v3435_v34  ;;  %v1982_v16 = vsel %vm1958_vm9, %v1949_v15, %v3436_v21 }
 0x20e   : > { %v1934_v22 = vsel %vm1925_vm8, %v1901_v2, %v3460_v54  ;;  %v1935_v5 = vsel %vm1925_vm8, %v1902_v23, %v3461_v44  ;;  %v3526_v13 = vunpack.i.h.bf16 %v3524_v35  ;;  %v3525_v37 = vunpack.i.l.bf16 %v3524_v35  ;;  %v3519_v61 = vpop.permute.xlu1 %3518  ;;  %v6061_v2 = vld [vmem:[#allocation26_spill] sm:$0xff] }
 0x20f   : > { %v1967_v57 = vsel %vm1958_vm9, %v1934_v22, %v3405_v51  ;;  %v1968_v36 = vsel %vm1958_vm9, %v1935_v5, %v3406_v3  ;;  %v3521_v53 = vunpack.i.h.bf16 %v3519_v61  ;;  %v3520_v30 = vunpack.i.l.bf16 %v3519_v61  ;;  %2606 = vrot.lane.b32.xlu0 %v5009_v11, %s3747_s9  ;;  %v6062_v22 = vld [vmem:[#allocation29_spill] sm:$0xff] }
 0x210   : > { %v2000_v9 = vsel %vm1991_vm10, %v1967_v57, %v3465_v24  ;;  %v2001_v56 = vsel %vm1991_vm10, %v1968_v36, %v3466_v46  ;;  %v3410_v34 = vunpack.i.l.bf16 %v4931_v41  ;;  %v1821_v21 = vsel %vm420_vm1, %v1789_v29, %v3526_v13  ;;  %2608 = vrot.lane.b32.xlu1 %v4994_v19, %s3747_s9  ;;  %v6057_v41 = vld [vmem:[#allocation18_spill] sm:$0xff] }
 0x211   : > { %v1820_v31 = vsel %vm420_vm1, %v5149_v60, %v3525_v37  ;;  %v2028_v3 = vpack.c.bf16 %v2001_v56, %v2000_v9  ;;  %v1854_v51 = vsel %vm1826_vm5, %v1821_v21, %v3476_v40  ;;  %v5221_v11 = vsel %vm1991_vm10, %v1981_v33, %v3520_v30  ;;  %v5226_v46 = vpop.permute.xlu0 %3538  ;;  %v6059_v40 = vld [vmem:[#allocation23_spill] sm:$0xff]  ;;  %v6064_v56 = vld [vmem:[#allocation32_spill] sm:$0xff] }
 0x212   : > { %v1853_v44 = vsel %vm1826_vm5, %v1820_v31, %v3475_v25  ;;  %v5224_v54 = vsel %vm1991_vm10, %v1982_v16, %v3521_v53  ;;  %v3336_v29 = vunpack.i.h.bf16 %v4829_v27  ;;  %v3481_v60 = vunpack.i.h.bf16 %v5119_v45  ;;  %v3529_v6 = vpop.permute.xlu1 %3528  ;;  %v6058_v27 = vld [vmem:[#allocation21_spill] sm:$0xff]  ;;  %v6063_v9 = vld [vmem:[#allocation31_spill] sm:$0xff] }
 0x213   : > { %v3480_v24 = vunpack.i.l.bf16 %v5119_v45  ;;  %3000 = vmatprep.mubr.msk.bf16.mxu1 %vm2059_vm11, %v2028_v3  ;;  %v3531_v50 = vunpack.i.h.bf16 %v3529_v6  ;;  %v3530_v42 = vunpack.i.l.bf16 %v3529_v6  ;;  %2610 = vrot.lane.b32.xlu0 %v5005_v49, %s3747_s9  ;;  %v1886_v12 = vsel %vm1859_vm6, %v1853_v44, %v3410_v34  ;;  %v6060_v25 = vld [vmem:[#allocation25_spill] sm:$0xff] }
 0x214   : > { %v1887_v1 = vsel %vm1859_vm6, %v1854_v51, %v3411_v0  ;;  %v1818_v45 = vsel %vm420_vm1, %v5136_v58, %v3335_v20  ;;  %v1819_v10 = vsel %vm420_vm1, %v5153_v43, %v3336_v29  ;;  %2612 = vrot.lane.b32.xlu1 %v5020_v48, %s3747_s9  ;;  %v735_v0 = vadd.f32 %v4527_v7, %v6057_v41 }
 0x215   : > { %v5249_v47 = vsel %vm1892_vm7, %v1886_v12, %v3480_v24  ;;  %v5252_v49 = vsel %vm1892_vm7, %v1887_v1, %v3481_v60  ;;  %v740_v8 = vadd.f32 %v6058_v27, %v4527_v7  ;;  %v1852_v58 = vsel %vm1826_vm5, %v1819_v10, %v3531_v50  ;;  %v5260_v43 = vpop.permute.xlu0 %3543  ;;  %v6066_v60 = vld [vmem:[#allocation51_spill] sm:$0xff] }
 0x216   : > { %v1851_v20 = vsel %vm1826_vm5, %v1818_v45, %v3530_v42  ;;  %v738_v48 = vadd.f32 %v4527_v7, %v6059_v40  ;;  %v5266_v38 = vadd.f32 %v6060_v25, %v4527_v7  ;;  %v3446_v28 = vunpack.i.h.bf16 %v4988_v59  ;;  %v3534_v52 = vpop.permute.xlu1 %3533  ;;  %v6068_v12 = vld [vmem:[#allocation63_spill] sm:$0xff] }
 0x217   : > { %v3445_v15 = vunpack.i.l.bf16 %v4988_v59  ;;  %v739_v23 = vadd.f32 %v4527_v7, %v6061_v2  ;;  %v5274_v5 = vadd.f32 %v6062_v22, %v4527_v7  ;;  %v3536_v35 = vunpack.i.h.bf16 %v3534_v52  ;;  %2614 = vrot.lane.b32.xlu0 %v735_v0, %s3747_s9  ;;  %v6069_v0 = vld [vmem:[#allocation53_spill] sm:$0xff]  ;;  %v6086_v22 = vld [vmem:[#allocation55_spill] sm:$0xff] }
 0x218   : > { %v3535_v33 = vunpack.i.l.bf16 %v3534_v52  ;;  %v3486_v16 = vunpack.i.h.bf16 %v5121_v14  ;;  %v3485_v13 = vunpack.i.l.bf16 %v5121_v14  ;;  %v1885_v59 = vsel %vm1859_vm6, %v1852_v58, %v3446_v28  ;;  %2616 = vrot.lane.b32.xlu1 %v5014_v55, %s3747_s9  ;;  %v6070_v58 = vld [vmem:[#allocation54_spill] sm:$0xff]  ;;  %v6073_v2 = vld [vmem:[#allocation57_spill] sm:$0xff] }
 0x219   : > { %v1884_v37 = vsel %vm1859_vm6, %v1851_v20, %v3445_v15  ;;  %v3416_v61 = vunpack.i.h.bf16 %v4967_v18  ;;  %v3415_v57 = vunpack.i.l.bf16 %v4967_v18  ;;  %v1918_v53 = vsel %vm1892_vm7, %v1885_v59, %v3536_v35  ;;  %v5287_v30 = vpop.permute.xlu0 %3553  ;;  %v6065_v18 = vld [vmem:[#allocation35_spill] sm:$0xff]  ;;  %v6072_v15 = vld [vmem:[#allocation56_spill] sm:$0xff]  ;;  %v6074_v35 = vld [vmem:[#allocation58_spill] sm:$0xff] }
 0x21a   : > { %v1917_v36 = vsel %vm1892_vm7, %v1884_v37, %v3535_v33  ;;  %v742_v14 = vadd.f32 %v4527_v7, %v6063_v9  ;;  %v5293_v34 = vadd.f32 %v6064_v56, %v4527_v7  ;;  %v1951_v55 = vsel %vm1925_vm8, %v1918_v53, %v3486_v16  ;;  %v5297_v31 = vpop.permute.xlu1 %3548  ;;  %v6075_v16 = vld [vmem:[#allocation62_spill] sm:$0xff]  ;;  %v6076_v37 = vld [vmem:[#allocation44_spill] sm:$0xff] }
 0x21b   : > { %v1950_v21 = vsel %vm1925_vm8, %v1917_v36, %v3485_v13  ;;  %v743_v3 = vadd.f32 %v4527_v7, %v6065_v18  ;;  %v3130_v51 = vunpack.i.l.bf16 %v4568_v63  ;;  %2618 = vrot.lane.b32.xlu0 %v5060_v26, %s3747_s9  ;;  %v5308_v29 = vsel %vm1958_vm9, %v1951_v55, %v3416_v61  ;;  %v6067_v7 = vld [vmem:[#allocation52_spill] sm:$0xff] }
 0x21c   : > { %v5305_v44 = vsel %vm1958_vm9, %v1950_v21, %v3415_v57  ;;  %v3391_v50 = vunpack.i.h.bf16 %v4874_v62  ;;  %v3425_v42 = vunpack.i.l.bf16 %v4965_v4  ;;  %2620 = vrot.lane.b32.xlu1 %v738_v48, %s3747_s9  ;;  %v3216_v26 = vunpack.i.h.bf16 %v6068_v12  ;;  %v6071_v48 = vld [vmem:[#allocation34_spill] sm:$0xff]  ;;  %v6077_v9 = vld [vmem:[#allocation60_spill] sm:$0xff] }
 0x21d   : > { %v3501_v1 = vunpack.i.h.bf16 %v5169_v32  ;;  %v3500_v45 = vunpack.i.l.bf16 %v5169_v32  ;;  %v5319_v10 = vpop.permute.xlu0 %3558  ;;  %v3105_v41 = vunpack.i.l.bf16 %v6067_v7  ;;  %v3136_v20 = vunpack.i.h.bf16 %v6070_v58  ;;  %v6078_v21 = vld [vmem:[#allocation4_spill] sm:$0xff]  ;;  %v6085_v62 = vld [vmem:[#allocation42_spill] sm:$0xff] }
 0x21e   : > { %v5325_v40 = vpop.permute.xlu1 %3568  ;;  %v1781_v25 = vsel %vm1761_vm4, %v6071_v48, %v3130_v51  ;;  %v3135_v28 = vunpack.i.l.bf16 %v6070_v58  ;;  %v3166_v52 = vunpack.i.h.bf16 %v6072_v15  ;;  %v3165_v32 = vunpack.i.l.bf16 %v6072_v15 }
 0x21f   : > { %2622 = vrot.lane.b32.xlu0 %v739_v23, %s3747_s9  ;;  %v3176_v33 = vunpack.i.h.bf16 %v6074_v35  ;;  %v1772_v13 = vsel %vm1761_vm4, %v6075_v16, %v3391_v50  ;;  %v1773_v59 = vsel %vm1761_vm4, %v6076_v37, %v3425_v42  ;;  %v3175_v61 = vunpack.i.l.bf16 %v6074_v35  ;;  %v6079_v42 = vld [vmem:[#allocation61_spill] sm:$0xff] }
 0x220   : > { %2624 = vrot.lane.b32.xlu1 %v740_v8, %s3747_s9  ;;  %v1813_v57 = vsel %vm420_vm1, %v1781_v25, %v3216_v26  ;;  %v1804_v36 = vsel %vm420_vm1, %v1772_v13, %v3500_v45  ;;  %v1805_v23 = vsel %vm420_vm1, %v1773_v59, %v3501_v1  ;;  %v3451_v55 = vunpack.i.h.bf16 %v6078_v21  ;;  %v6080_v37 = vld [vmem:[#allocation65_spill] sm:$0xff]  ;;  %v6084_v8 = vld [vmem:[#allocation2_spill] sm:$0xff] }
 0x221   : > { %v5344_v53 = vpop.permute.xlu0 %3563  ;;  %v3450_v18 = vunpack.i.l.bf16 %v6078_v21  ;;  %v3556_v51 = vunpack.i.h.bf16 %v5287_v30  ;;  %v3215_v1 = vunpack.i.l.bf16 %v6068_v12  ;;  %v5359_v48 = vsel %vm1826_vm5, %v1813_v57, %v3166_v52  ;;  %v6081_v21 = vld [vmem:[#allocation72_spill] sm:$0xff] }
 0x222   : > { %v5350_v50 = vpop.permute.xlu1 %3588  ;;  %v1838_v16 = vsel %vm1826_vm5, %v1805_v23, %v3451_v55  ;;  %v3540_v13 = vunpack.i.l.bf16 %v5226_v46  ;;  %v3221_v59 = vunpack.i.h.bf16 %v6080_v37  ;;  %v3401_v19 = vunpack.i.h.bf16 %v6081_v21  ;;  %v6082_v23 = vld [vmem:[#allocation39_spill] sm:$0xff] }
 0x223   : > { %2626 = vrot.lane.b32.xlu0 %v5266_v38, %s3747_s9  ;;  %v1837_v25 = vsel %vm1826_vm5, %v1804_v36, %v3450_v18  ;;  %v3400_v12 = vunpack.i.l.bf16 %v6081_v21  ;;  %v3426_v63 = vunpack.i.h.bf16 %v4965_v4  ;;  %v3220_v52 = vunpack.i.l.bf16 %v6080_v37  ;;  %v6083_v18 = vld [vmem:[#allocation66_spill] sm:$0xff] }
 0x224   : > { %2628 = vrot.lane.b32.xlu1 %v742_v14, %s3747_s9  ;;  %v3470_v57 = vunpack.i.l.bf16 %v5099_v17  ;;  %v3541_v36 = vunpack.i.h.bf16 %v5226_v46  ;;  %v1780_v55 = vsel %vm1761_vm4, %v6082_v23, %v3556_v51  ;;  %v3226_v56 = vunpack.i.h.bf16 %v6083_v18 }
 0x225   : > { %v5369_v38 = vpop.permute.xlu0 %3573  ;;  %v3456_v27 = vunpack.i.h.bf16 %v6084_v8  ;;  %v1870_v4 = vsel %vm1859_vm6, %v1837_v25, %v3400_v12  ;;  %v1871_v21 = vsel %vm1859_vm6, %v1838_v16, %v3401_v19  ;;  %v3455_v37 = vunpack.i.l.bf16 %v6084_v8  ;;  %v6087_v16 = vld [vmem:[#allocation69_spill] sm:$0xff] }
 0x226   : > { %v5376_v14 = vpop.permute.xlu1 %3593  ;;  %v1775_v46 = vsel %vm1761_vm4, %v6085_v62, %v3540_v13  ;;  %v3555_v26 = vunpack.i.l.bf16 %v5287_v30  ;;  %v3566_v51 = vunpack.i.h.bf16 %v5344_v53  ;;  %v3225_v23 = vunpack.i.l.bf16 %v6083_v18 }
 0x227   : > { %2630 = vrot.lane.b32.xlu0 %v743_v3, %s3747_s9  ;;  %v1774_v3 = vsel %vm1761_vm4, %v6086_v22, %v3426_v63  ;;  %v3471_v25 = vunpack.i.h.bf16 %v5099_v17  ;;  %v1812_v19 = vsel %vm420_vm1, %v1780_v55, %v3215_v1  ;;  %v5400_v30 = vsel %vm1761_vm4, %v6087_v16, %v3541_v36  ;;  %v2320_v63 = vld [vmem:[%s5828_s5] sm:$0x1]  ;;  %v6088_v55 = vld [vmem:[#allocation45_spill] sm:$0xff] }
 0x228   : > { %2632 = vrot.lane.b32.xlu1 %v5274_v5, %s3747_s9  ;;  %v1806_v62 = vsel %vm420_vm1, %v1774_v3, %v3470_v57  ;;  %v1903_v5 = vsel %vm1892_vm7, %v1870_v4, %v3455_v37  ;;  %v1904_v12 = vsel %vm1892_vm7, %v1871_v21, %v3456_v27  ;;  %3063 = vmatprep.subr.msk.bf16.mxu0 %vm777_vm3, %v2320_v63  ;;  %v2377_v57 = vsel %vm777_vm3, %v2320_v63, 0  ;;  %v6089_v21 = vld [vmem:[#allocation68_spill] sm:$0xff] }
 0x229   : > { %v5395_v8 = vpop.permute.xlu0 %3578  ;;  %v1807_v1 = vsel %vm420_vm1, %v1775_v46, %v3471_v25  ;;  %v3546_v36 = vunpack.i.h.bf16 %v5260_v43  ;;  %v1845_v27 = vsel %vm1826_vm5, %v1812_v19, %v3165_v32  ;;  %v1779_v4 = vsel %vm1761_vm4, %v6088_v55, %v3555_v26  ;;  %3025 = vmatpush3.bf16.msra.mxu0 %v2377_v57  ;;  %v6090_v55 = vld [vmem:[#allocation47_spill] sm:$0xff] }
 0x22a   : > { %v3599_v13 = vpop.permute.xlu1 %3598  ;;  %v1778_v37 = vsel %vm1761_vm4, %v6089_v21, %v3566_v51  ;;  %v3565_v46 = vunpack.i.l.bf16 %v5344_v53  ;;  %v3550_v32 = vunpack.i.l.bf16 %v5297_v31  ;;  %v3561_v53 = vunpack.i.h.bf16 %v5319_v10 }
 0x22b   : > { %v3601_v17 = vunpack.i.h.bf16 %v3599_v13  ;;  %v3600_v22 = vunpack.i.l.bf16 %v3599_v13  ;;  %2634 = vrot.lane.b32.xlu0 %v5293_v34, %s3747_s9  ;;  %v3545_v34 = vunpack.i.l.bf16 %v5260_v43  ;;  %v5433_v13 = vsel %vm1859_vm6, %v1845_v27, %v3105_v41 }
 0x22c   : > { %v3560_v63 = vunpack.i.l.bf16 %v5319_v10  ;;  %v3591_v57 = vunpack.i.h.bf16 %v5350_v50  ;;  %v1777_v41 = vsel %vm1761_vm4, %v6090_v55, %v3565_v46  ;;  %v3596_v27 = vunpack.i.h.bf16 %v5376_v14 }
 0x22d   : > { %v1811_v3 = vsel %vm420_vm1, %v1779_v4, %v3601_v17  ;;  %v1810_v25 = vsel %vm420_vm1, %v1778_v37, %v3600_v22  ;;  %v5424_v16 = vpop.permute.xlu0 %3583  ;;  %v3571_v17 = vunpack.i.h.bf16 %v5325_v40  ;;  %v3570_v22 = vunpack.i.l.bf16 %v5325_v40 }
 0x22e   : > { %v1844_v26 = vsel %vm1826_vm5, %v1811_v3, %v3221_v59  ;;  %v1843_v19 = vsel %vm1826_vm5, %v1810_v25, %v3220_v52  ;;  %v3609_v51 = vpop.permute.xlu1 %3608  ;;  %v3590_v59 = vunpack.i.l.bf16 %v5350_v50  ;;  %v3581_v4 = vunpack.i.h.bf16 %v5395_v8 }
 0x22f   : > { %v1876_v52 = vsel %vm1859_vm6, %v1843_v19, %v3135_v28  ;;  %v1877_v10 = vsel %vm1859_vm6, %v1844_v26, %v3136_v20  ;;  %v3580_v21 = vunpack.i.l.bf16 %v5395_v8  ;;  %v3585_v50 = vunpack.i.l.bf16 %v5424_v16 }
 0x230   : > { %v1909_v28 = vsel %vm1892_vm7, %v1876_v52, %v3225_v23  ;;  %v3611_v19 = vunpack.i.h.bf16 %v3609_v51  ;;  %v1910_v45 = vsel %vm1892_vm7, %v1877_v10, %v3226_v56  ;;  %v3610_v58 = vunpack.i.l.bf16 %v3609_v51 }
 0x231   : > { %v3604_v40 = vpop.permute.xlu0 %3603  ;;  %v1942_v56 = vsel %vm1925_vm8, %v1909_v28, %v3175_v61 }
 0x232   : > { %v3606_v37 = vunpack.i.h.bf16 %v3604_v40  ;;  %v3605_v3 = vunpack.i.l.bf16 %v3604_v40  ;;  %v3619_v25 = vpop.permute.xlu1 %3618 }
 0x233   : > { %v3621_v46 = vunpack.i.h.bf16 %v3619_v25  ;;  %v3620_v55 = vunpack.i.l.bf16 %v3619_v25 }
 0x234   : > { %v1937_v20 = vsel %vm1925_vm8, %v1904_v12, %v3606_v37  ;;  %v1936_v26 = vsel %vm1925_vm8, %v1903_v5, %v3605_v3 }
 0x235   : > { %v1970_v8 = vsel %vm1958_vm9, %v1937_v20, %v3561_v53  ;;  %v1969_v24 = vsel %vm1958_vm9, %v1936_v26, %v3560_v63  ;;  %v1840_v40 = vsel %vm1826_vm5, %v1807_v1, %v3621_v46  ;;  %v1839_v23 = vsel %vm1826_vm5, %v1806_v62, %v3620_v55  ;;  %v3614_v52 = vpop.permute.xlu0 %3613  ;;  %v6094_v26 = vld [vmem:[#allocation64_spill] sm:$0xff] }
 0x236   : > { %v3616_v6 = vunpack.i.h.bf16 %v3614_v52  ;;  %v3615_v25 = vunpack.i.l.bf16 %v3614_v52  ;;  %v3624_v15 = vpop.permute.xlu1 %3623  ;;  %v1872_v18 = vsel %vm1859_vm6, %v1839_v23, %v3570_v22  ;;  %v2002_v51 = vsel %vm1991_vm10, %v1969_v24, %v3610_v58 }
 0x237   : > { %v3626_v12 = vunpack.i.h.bf16 %v3624_v15  ;;  %v3625_v5 = vunpack.i.l.bf16 %v3624_v15  ;;  %v2003_v53 = vsel %vm1991_vm10, %v1970_v8, %v3611_v19  ;;  %v1873_v63 = vsel %vm1859_vm6, %v1840_v40, %v3571_v17 }
 0x238   : > { %v1808_v1 = vsel %vm420_vm1, %v5400_v30, %v3615_v25  ;;  %v1809_v62 = vsel %vm420_vm1, %v1777_v41, %v3616_v6  ;;  %v2029_v10 = vpack.c.bf16 %v2003_v53, %v2002_v51  ;;  %v6093_v58 = vunpack.i.h.bf16 %v6066_v60  ;;  %v6097_v25 = vld [vmem:[#allocation70_spill] sm:$0xff] }
 0x239   : > { %v1841_v22 = vsel %vm1826_vm5, %v1808_v1, %v3580_v21  ;;  %v1842_v37 = vsel %vm1826_vm5, %v1809_v62, %v3581_v4  ;;  %v1905_v61 = vsel %vm1892_vm7, %v1872_v18, %v3625_v5  ;;  %v1906_v15 = vsel %vm1892_vm7, %v1873_v63, %v3626_v12  ;;  %v5477_v3 = vpop.permute.xlu0 %3633 }
 0x23a   : > { %v1874_v24 = vsel %vm1859_vm6, %v1841_v22, %v3545_v34  ;;  %v1875_v30 = vsel %vm1859_vm6, %v1842_v37, %v3546_v36  ;;  %v1938_v6 = vsel %vm1925_vm8, %v1905_v61, %v3590_v59  ;;  %v1939_v17 = vsel %vm1925_vm8, %v1906_v15, %v3591_v57  ;;  %3001 = vmatmul.mubr.msk.bf16.gmra.mrb[24].mxu1 %vm2059_vm11, %v2029_v10  ;;  %v3629_v41 = vpop.permute.xlu1 %3628 }
 0x23b   : > { %v3595_v4 = vunpack.i.l.bf16 %v5376_v14  ;;  %v3586_v21 = vunpack.i.h.bf16 %v5424_v16  ;;  %v1907_v28 = vsel %vm1892_vm7, %v1874_v24, %v3585_v50  ;;  %v1943_v34 = vsel %vm1925_vm8, %v1910_v45, %v3176_v33 }
 0x23c   : > { %v3631_v43 = vunpack.i.h.bf16 %v3629_v41  ;;  %v3630_v19 = vunpack.i.l.bf16 %v3629_v41  ;;  %v1971_v36 = vsel %vm1958_vm9, %v1938_v6, %v3550_v32  ;;  %v6091_v57 = vunpack.i.h.bf16 %v5297_v31  ;;  %v6104_v6 = vld [vmem:[#allocation67_spill] sm:$0xff] }
 0x23d   : > { %v1908_v14 = vsel %vm1892_vm7, %v1875_v30, %v3586_v21  ;;  %v5499_v46 = vpop.permute.xlu0 %1025  ;;  %v2004_v16 = vsel %vm1991_vm10, %v1971_v36, %v3595_v4  ;;  %v6092_v33 = vunpack.i.l.bf16 %v6066_v60  ;;  %v1976_v20 = vsel %vm1958_vm9, %v1943_v34, %v6093_v58 }
 0x23e   : > { %v1972_v59 = vsel %vm1958_vm9, %v1939_v17, %v6091_v57  ;;  %v5508_v50 = vsel %vm1991_vm10, %v5308_v29, %v3631_v43  ;;  %v5512_v31 = vsel %vm1991_vm10, %v5305_v44, %v3630_v19  ;;  %v3639_v32 = vpop.permute.xlu1 %3638  ;;  %v6095_v40 = vunpack.i.l.bf16 %v6079_v42 }
 0x23f   : > { %v2005_v35 = vsel %vm1991_vm10, %v1972_v59, %v3596_v27  ;;  %v1975_v45 = vsel %vm1958_vm9, %v1942_v56, %v6092_v33  ;;  %v3210_v27 = vunpack.i.l.bf16 %v6094_v26  ;;  %v2036_v8 = vpack.c.bf16 %v5508_v50, %v5512_v31 }
 0x240   : > { %v2030_v55 = vpack.c.bf16 %v2005_v35, %v2004_v16  ;;  %v1940_v29 = vsel %vm1925_vm8, %v1907_v28, %v6095_v40  ;;  %v6096_v23 = vunpack.i.l.bf16 %v6073_v2  ;;  %v3211_v52 = vunpack.i.h.bf16 %v6094_v26  ;;  %v6105_v28 = vld [vmem:[#allocation71_spill] sm:$0xff] }
 0x241   : > { %v3365_v60 = vunpack.i.l.bf16 %v6097_v25  ;;  %v6098_v18 = vunpack.i.h.bf16 %v6079_v42  ;;  %v6099_v12 = vunpack.i.l.bf16 %v6069_v0  ;;  %v5536_v51 = vpop.permute.xlu0 %3643  ;;  %v6100_v53 = vunpack.i.h.bf16 %v6069_v0  ;;  %v6106_v26 = vld [vmem:[#allocation59_spill] sm:$0xff] }
 0x242   : > { %v1911_v44 = vsel %vm1892_vm7, %v5433_v13, %v6096_v23  ;;  %3004 = vmatprep.mubr.msk.bf16.mxu1 %vm2059_vm11, %v2030_v55  ;;  %v6101_v62 = vunpack.i.l.bf16 %v6077_v9  ;;  %v6102_v42 = vunpack.i.h.bf16 %v6077_v9  ;;  %v6103_v22 = vunpack.i.h.bf16 %v6067_v7  ;;  %v5554_v15 = vpop.permute.xlu1 %3648  ;;  %v6107_v23 = vld [vmem:[#allocation36_spill] sm:$0xff] }
 0x243   : > { %v1941_v56 = vsel %vm1925_vm8, %v1908_v14, %v6098_v18  ;;  %v1973_v5 = vsel %vm1958_vm9, %v1940_v29, %v6099_v12  ;;  %v3366_v61 = vunpack.i.h.bf16 %v6097_v25  ;;  %v1944_v24 = vsel %vm1925_vm8, %v1911_v44, %v3365_v60  ;;  %v6109_v25 = vld [vmem:[#allocation74_spill] sm:$0xff] }
 0x244   : > { %v1974_v13 = vsel %vm1958_vm9, %v1941_v56, %v6100_v53  ;;  %v2006_v1 = vsel %vm1991_vm10, %v1973_v5, %v3210_v27  ;;  %v2008_v63 = vsel %vm1991_vm10, %v1975_v45, %v6101_v62  ;;  %v2009_v10 = vsel %vm1991_vm10, %v1976_v20, %v6102_v42  ;;  %v6112_v56 = vld [vmem:[#allocation50_spill] sm:$0xff] }
 0x245   : > { %v1879_v37 = vsel %vm1859_vm6, %v5359_v48, %v6103_v22  ;;  %v2007_v0 = vsel %vm1991_vm10, %v1974_v13, %v3211_v52  ;;  %v3171_v30 = vunpack.i.h.bf16 %v6073_v2  ;;  %v3275_v17 = vunpack.i.l.bf16 %v6104_v6  ;;  %v5561_v7 = vpop.permute.xlu0 %3653 }
 0x246   : > { %v2031_v9 = vpack.c.bf16 %v2007_v0, %v2006_v1  ;;  %v2032_v41 = vpack.c.bf16 %v2009_v10, %v2008_v63  ;;  %v3371_v34 = vunpack.i.h.bf16 %v6105_v28  ;;  %v3370_v43 = vunpack.i.l.bf16 %v6105_v28  ;;  %v5568_v2 = vpop.permute.xlu1 %3663 }
 0x247   : > { %v1912_v4 = vsel %vm1892_vm7, %v1879_v37, %v3171_v30  ;;  %v1977_v48 = vsel %vm1958_vm9, %v1944_v24, %v3275_v17  ;;  %v3276_v19 = vunpack.i.h.bf16 %v6104_v6  ;;  %v3441_v59 = vunpack.i.h.bf16 %v4986_v39 }
 0x248   : > { %3005 = vmatmul.mubr.msk.bf16.gmra.mrb[28].mxu1 %vm2059_vm11, %v2031_v9  ;;  %v1945_v21 = vsel %vm1925_vm8, %v1912_v4, %v3366_v61  ;;  %v2010_v36 = vsel %vm1991_vm10, %v1977_v48, %v3370_v43  ;;  %v3636_v35 = vunpack.i.h.bf16 %v5477_v3  ;;  %v3635_v33 = vunpack.i.l.bf16 %v5477_v3  ;;  %v6108_v3 = vld [vmem:[#allocation43_spill] sm:$0xff] }
 0x249   : > { %3008 = vmatprep.mubr.msk.bf16.mxu1 %vm2059_vm11, %v2032_v41  ;;  %v1978_v57 = vsel %vm1958_vm9, %v1945_v21, %v3276_v19  ;;  %v5574_v14 = vpop.permute.xlu0 %3658  ;;  %v3641_v55 = vunpack.i.h.bf16 %v3639_v32  ;;  %v3640_v58 = vunpack.i.l.bf16 %v3639_v32  ;;  %v1790_v27 = vsel %vm1761_vm4, %v6106_v26, %v3441_v59  ;;  %v6110_v32 = vld [vmem:[#allocation73_spill] sm:$0xff] }
 0x24a   : > { %v2011_v16 = vsel %vm1991_vm10, %v1978_v57, %v3371_v34  ;;  %v5579_v45 = vpop.permute.xlu1 %3673  ;;  %v3576_v39 = vunpack.i.h.bf16 %v5369_v38  ;;  %v3575_v29 = vunpack.i.l.bf16 %v5369_v38  ;;  %v1792_v44 = vsel %vm1761_vm4, %v6107_v23, %v3636_v35 }
 0x24b   : > { %v2033_v20 = vpack.c.bf16 %v2011_v16, %v2010_v36  ;;  %v1791_v52 = vsel %vm1761_vm4, %v6108_v3, %v3635_v33  ;;  %v6111_v60 = vpack.c.bf16 %v6109_v25, %v6110_v32  ;;  %v1793_v12 = vsel %vm1761_vm4, %v6112_v56, %v5499_v46 }
 0x24c   : > { %v1822_v5 = vsel %vm420_vm1, %v1790_v27, %v3640_v58  ;;  %v1823_v38 = vsel %vm420_vm1, %v1791_v52, %v3641_v55  ;;  %v3646_v53 = vunpack.i.h.bf16 %v5536_v51  ;;  %v3645_v13 = vunpack.i.l.bf16 %v5536_v51 }
 0x24d   : > { %v5584_v40 = vpop.permute.xlu0 %3668  ;;  %v3651_v1 = vunpack.i.h.bf16 %v5554_v15  ;;  %v3650_v62 = vunpack.i.l.bf16 %v5554_v15  ;;  %v3656_v63 = vunpack.i.h.bf16 %v5561_v7  ;;  %v3655_v42 = vunpack.i.l.bf16 %v5561_v7 }
 0x24e   : > { %v3684_v18 = vpop.permute.xlu1 %3683  ;;  %v3666_v10 = vunpack.i.h.bf16 %v5568_v2  ;;  %v3665_v46 = vunpack.i.l.bf16 %v5568_v2  ;;  %v3661_v22 = vunpack.i.h.bf16 %v5574_v14  ;;  %v3660_v61 = vunpack.i.l.bf16 %v5574_v14 }
 0x24f   : > { %v3676_v0 = vunpack.i.h.bf16 %v5579_v45  ;;  %v3675_v15 = vunpack.i.l.bf16 %v5579_v45  ;;  %v3671_v6 = vunpack.i.h.bf16 %v5584_v40  ;;  %v3686_v41 = vunpack.i.h.bf16 %v3684_v18 }
 0x250   : > { %3009 = vmatmul.mubr.msk.bf16.gmra.mrb[32].mxu1 %vm2059_vm11, %v2033_v20  ;;  %v3685_v4 = vunpack.i.l.bf16 %v3684_v18  ;;  %v6113_v34 = vpack.c.bf16 %v5224_v54, %v5221_v11  ;;  %v3670_v36 = vunpack.i.l.bf16 %v5584_v40 }
 0x251   : > { %3012 = vmatprep.mubr.msk.bf16.mxu1 %vm2059_vm11, %v6111_v60  ;;  %v3679_v37 = vpop.permute.xlu0 %3678 }
 0x252   : > { %v3681_v51 = vunpack.i.h.bf16 %v3679_v37  ;;  %v3680_v24 = vunpack.i.l.bf16 %v3679_v37  ;;  %v3694_v30 = vpop.permute.xlu1 %3693 }
 0x253   : > { %v3696_v17 = vunpack.i.h.bf16 %v3694_v30  ;;  %v3695_v9 = vunpack.i.l.bf16 %v3694_v30 }
 0x254   : > { %v1953_v7 = vsel %vm1925_vm8, %v5252_v49, %v3681_v51  ;;  %v1952_v48 = vsel %vm1925_vm8, %v5249_v47, %v3680_v24 }
 0x255   : > { %v1986_v21 = vsel %vm1958_vm9, %v1953_v7, %v3576_v39  ;;  %v1985_v28 = vsel %vm1958_vm9, %v1952_v48, %v3575_v29  ;;  %v1855_v43 = vsel %vm1826_vm5, %v1822_v5, %v3695_v9  ;;  %v1856_v2 = vsel %vm1826_vm5, %v1823_v38, %v3696_v17  ;;  %v3689_v19 = vpop.permute.xlu0 %3688 }
 0x256   : > { %v3691_v47 = vunpack.i.h.bf16 %v3689_v19  ;;  %v3690_v49 = vunpack.i.l.bf16 %v3689_v19  ;;  %v3699_v57 = vpop.permute.xlu1 %3698  ;;  %v1888_v59 = vsel %vm1859_vm6, %v1855_v43, %v3650_v62  ;;  %v2018_v14 = vsel %vm1991_vm10, %v1985_v28, %v3685_v4 }
 0x257   : > { %v3701_v11 = vunpack.i.h.bf16 %v3699_v57  ;;  %v3700_v54 = vunpack.i.l.bf16 %v3699_v57  ;;  %v2019_v16 = vsel %vm1991_vm10, %v1986_v21, %v3686_v41  ;;  %v1889_v45 = vsel %vm1859_vm6, %v1856_v2, %v3651_v1 }
 0x258   : > { %3013 = vmatmul.mubr.msk.bf16.gmra.mrb[36].mxu1 %vm2059_vm11, %v6113_v34  ;;  %v1825_v35 = vsel %vm420_vm1, %v1793_v12, %v3691_v47  ;;  %v1824_v33 = vsel %vm420_vm1, %v1792_v44, %v3690_v49  ;;  %v2037_v50 = vpack.c.bf16 %v2019_v16, %v2018_v14 }
 0x259   : > { %3016 = vmatprep.mubr.msk.bf16.mxu1 %vm2059_vm11, %v2036_v8  ;;  %v1857_v31 = vsel %vm1826_vm5, %v1824_v33, %v3645_v13  ;;  %v1858_v8 = vsel %vm1826_vm5, %v1825_v35, %v3646_v53  ;;  %v1921_v55 = vsel %vm1892_vm7, %v1888_v59, %v3700_v54  ;;  %v1922_v58 = vsel %vm1892_vm7, %v1889_v45, %v3701_v11  ;;  %v1633_v20 = vpop.permute.xlu0 %1632 }
 0x25a   : > { %v1954_v26 = vsel %vm1925_vm8, %v1921_v55, %v3665_v46  ;;  %v1955_v27 = vsel %vm1925_vm8, %v1922_v58, %v3666_v10  ;;  %v1890_v40 = vsel %vm1859_vm6, %v1857_v31, %v3655_v42  ;;  %v1891_v39 = vsel %vm1859_vm6, %v1858_v8, %v3656_v63  ;;  %v3704_v29 = vpop.permute.xlu1 %3703  ;;  %v5663_v46 = vld [vmem:[%s5827_s4] ss:$0 sm:$0xff] }
 0x25b   : > { %v1923_v23 = vsel %vm1892_vm7, %v1890_v40, %v3660_v61  ;;  %v1924_v44 = vsel %vm1892_vm7, %v1891_v39, %v3661_v22  ;;  %v3706_v3 = vunpack.i.h.bf16 %v3704_v29  ;;  %v3705_v52 = vunpack.i.l.bf16 %v3704_v29 }
 0x25c   : > { %v1956_v25 = vsel %vm1925_vm8, %v1923_v23, %v3670_v36  ;;  %v1957_v32 = vsel %vm1925_vm8, %v1924_v44, %v3671_v6  ;;  %v1987_v60 = vsel %vm1958_vm9, %v1954_v26, %v3675_v15  ;;  %v1988_v18 = vsel %vm1958_vm9, %v1955_v27, %v3676_v0 }
 0x25d   : > { %v2020_v56 = vsel %vm1991_vm10, %v1987_v60, %v3705_v52  ;;  %v2021_v12 = vsel %vm1991_vm10, %v1988_v18, %v3706_v3  ;;  %v3709_v5 = vpop.permute.xlu0 %3708  ;;  %v1989_v1 = vsel %vm1958_vm9, %v1956_v25, %v1633_v20  ;;  %v1990_v62 = vsel %vm1958_vm9, %v1957_v32, %v1633_v20 }
 0x25e   : > { %v2038_v38 = vpack.c.bf16 %v2021_v12, %v2020_v56  ;;  %v3711_v53 = vunpack.i.h.bf16 %v3709_v5  ;;  %v3710_v13 = vunpack.i.l.bf16 %v3709_v5 }
 0x260   : > { %3017 = vmatmul.mubr.msk.bf16.gmra.mrb[40].mxu1 %vm2059_vm11, %v2037_v50  ;;  %v2022_v63 = vsel %vm1991_vm10, %v1989_v1, %v3710_v13  ;;  %v2023_v42 = vsel %vm1991_vm10, %v1990_v62, %v3711_v53 }
 0x261   : > { %3020 = vmatprep.mubr.msk.bf16.mxu1 %vm2059_vm11, %v2038_v38  ;;  %v2039_v10 = vpack.c.bf16 %v2023_v42, %v2022_v63 }
 0x268   : > { %3021 = vmatmul.mubr.msk.bf16.gmra.mrb[44].mxu1 %vm2059_vm11, %v2039_v10 }
 0x2a3   : > { %v2994_v22 = vpop.f32.mrb[16].mxu1 }
 0x2a4   : > { %v2154_v37 = vadd.f32 %v2994_v22, %v5663_v46  ;;  %v2145_v61 = vpop.f32.mrb[17].mxu1 }
 0x2a5   : > { %v2146_v0 = vadd.f32 %v5663_v46, %v2145_v61  ;;  %v2995_v51 = vpop.f32.mrb[18].mxu1 }
 0x2a6   : > { %v2157_v24 = vadd.f32 %v2995_v51, %v5663_v46  ;;  %v2148_v30 = vpop.f32.mrb[19].mxu1  ;;  %v2274_v6 = vmax.f32 %v2154_v37, 0.0 }
 0x2a7   : > { %v2149_v15 = vadd.f32 %v5663_v46, %v2148_v30  ;;  %v2272_v9 = vmax.f32 %v2146_v0, 0.0 }
 0x2a8   : > { %v2275_v17 = vmax.f32 %v2157_v24, 0.0 }
 0x2a9   : > { %v2273_v41 = vmax.f32 %v2149_v15, 0.0 }
 0x2aa   : > { %v2305_v4 = vpack.c.bf16 %v2275_v17, %v2274_v6 }
 0x2ab   : > { %v2304_v7 = vpack.c.bf16 %v2273_v41, %v2272_v9 }
 0x2ad   : > { %3026 = vmatprep.mubr.msk.bf16.mxu0 %vm1761_vm4, %v2304_v7 }
 0x2ae   : > { %3027 = vmatmul.mubr.msk.bf16.vlgmr.msra.gmra.mrb[16].mxu0 %vm1761_vm4, %v2305_v4 }
 0x2dc   : > { %v2998_v48 = vpop.f32.mrb[20].mxu1 }
 0x2dd   : > { %v2170_v21 = vadd.f32 %v2998_v48, %v5663_v46  ;;  %v2161_v28 = vpop.f32.mrb[21].mxu1 }
 0x2de   : > { %v2162_v34 = vadd.f32 %v5663_v46, %v2161_v28  ;;  %v2999_v43 = vpop.f32.mrb[22].mxu1 }
 0x2df   : > { %v2173_v2 = vadd.f32 %v2999_v43, %v5663_v46  ;;  %v2164_v19 = vpop.f32.mrb[23].mxu1  ;;  %v2278_v47 = vmax.f32 %v2170_v21, 0.0 }
 0x2e0   : > { %v2165_v36 = vadd.f32 %v5663_v46, %v2164_v19  ;;  %v2276_v57 = vmax.f32 %v2162_v34, 0.0 }
 0x2e1   : > { %v2279_v49 = vmax.f32 %v2173_v2, 0.0 }
 0x2e2   : > { %v2277_v59 = vmax.f32 %v2165_v36, 0.0 }
 0x2e3   : > { %v2307_v11 = vpack.c.bf16 %v2279_v49, %v2278_v47 }
 0x2e4   : > { %v2306_v54 = vpack.c.bf16 %v2277_v59, %v2276_v57 }
 0x2e6   : > { %3030 = vmatprep.mubr.msk.bf16.mxu0 %vm1761_vm4, %v2306_v54 }
 0x2e7   : > { %3031 = vmatmul.mubr.msk.bf16.gmra.mrb[20].mxu0 %vm1761_vm4, %v2307_v11 }
 0x30d   : > { %v3002_v14 = vpop.f32.mrb[24].mxu1 }
 0x30e   : > { %v2186_v16 = vadd.f32 %v3002_v14, %v5663_v46  ;;  %v2177_v35 = vpop.f32.mrb[25].mxu1 }
 0x30f   : > { %v2178_v33 = vadd.f32 %v5663_v46, %v2177_v35  ;;  %v3003_v45 = vpop.f32.mrb[26].mxu1 }
 0x310   : > { %v2189_v50 = vadd.f32 %v3003_v45, %v5663_v46  ;;  %v2180_v31 = vpop.f32.mrb[27].mxu1  ;;  %v2282_v55 = vmax.f32 %v2186_v16, 0.0 }
 0x311   : > { %v2181_v8 = vadd.f32 %v5663_v46, %v2180_v31  ;;  %v2280_v20 = vmax.f32 %v2178_v33, 0.0 }
 0x312   : > { %v2283_v58 = vmax.f32 %v2189_v50, 0.0 }
 0x313   : > { %v2281_v26 = vmax.f32 %v2181_v8, 0.0 }
 0x314   : > { %v2309_v27 = vpack.c.bf16 %v2283_v58, %v2282_v55 }
 0x315   : > { %v2308_v40 = vpack.c.bf16 %v2281_v26, %v2280_v20 }
 0x317   : > { %3034 = vmatprep.mubr.msk.bf16.mxu0 %vm1761_vm4, %v2308_v40 }
 0x318   : > { %3035 = vmatmul.mubr.msk.bf16.gmra.mrb[24].mxu0 %vm1761_vm4, %v2309_v27 }
 0x31b   : > { %v3006_v39 = vpop.f32.mrb[28].mxu1 }
 0x31c   : > { %v2202_v29 = vadd.f32 %v3006_v39, %v5663_v46  ;;  %v2193_v23 = vpop.f32.mrb[29].mxu1 }
 0x31d   : > { %v2194_v44 = vadd.f32 %v5663_v46, %v2193_v23  ;;  %v3007_v3 = vpop.f32.mrb[30].mxu1 }
 0x31e   : > { %v2205_v52 = vadd.f32 %v3007_v3, %v5663_v46  ;;  %v2196_v25 = vpop.f32.mrb[31].mxu1  ;;  %v2286_v60 = vmax.f32 %v2202_v29, 0.0 }
 0x31f   : > { %v2197_v32 = vadd.f32 %v5663_v46, %v2196_v25  ;;  %v2284_v56 = vmax.f32 %v2194_v44, 0.0 }
 0x320   : > { %v2287_v18 = vmax.f32 %v2205_v52, 0.0 }
 0x321   : > { %v2285_v12 = vmax.f32 %v2197_v32, 0.0  ;;  %v2573_v32 = vpop.permute.xlu1 %2572 }
 0x322   : > { %v2311_v5 = vpack.c.bf16 %v2287_v18, %v2286_v60  ;;  %v2575_v60 = vpop.permute.xlu0 %2574  ;;  %v5716_v18 = vld [vmem:[%s5829_s6] ss:$0 sm:$0xff] }
 0x323   : > { %v2310_v38 = vpack.c.bf16 %v2285_v12, %v2284_v56  ;;  %v3010_v53 = vpop.f32.mrb[32].mxu1 }
 0x324   : > { %v2218_v13 = vadd.f32 %v3010_v53, %v5663_v46  ;;  %v2209_v1 = vpop.f32.mrb[33].mxu1 }
 0x325   : > { %v2210_v62 = vadd.f32 %v5663_v46, %v2209_v1  ;;  %v3011_v63 = vpop.f32.mrb[34].mxu1  ;;  %3038 = vmatprep.mubr.msk.bf16.mxu0 %vm1761_vm4, %v2310_v38 }
 0x326   : > { %v2221_v42 = vadd.f32 %v3011_v63, %v5663_v46  ;;  %v2212_v10 = vpop.f32.mrb[35].mxu1  ;;  %3039 = vmatmul.mubr.msk.bf16.gmra.mrb[28].mxu0 %vm1761_vm4, %v2311_v5  ;;  %v2290_v37 = vmax.f32 %v2218_v13, 0.0  ;;  %v2577_v5 = vpop.permute.xlu1 %2576 }
 0x327   : > { %v2213_v22 = vadd.f32 %v5663_v46, %v2212_v10  ;;  %v2288_v0 = vmax.f32 %v2210_v62, 0.0  ;;  %v2579_v63 = vpop.permute.xlu0 %2578 }
 0x328   : > { %v2291_v61 = vmax.f32 %v2221_v42, 0.0 }
 0x329   : > { %v2289_v51 = vmax.f32 %v2213_v22, 0.0 }
 0x32a   : > { %v2313_v24 = vpack.c.bf16 %v2291_v61, %v2290_v37 }
 0x32b   : > { %v2312_v30 = vpack.c.bf16 %v2289_v51, %v2288_v0  ;;  %v3014_v15 = vpop.f32.mrb[36].mxu1 }
 0x32c   : > { %v2234_v6 = vadd.f32 %v3014_v15, %v5663_v46  ;;  %v2225_v17 = vpop.f32.mrb[37].mxu1  ;;  %v2583_v15 = vpop.permute.xlu0 %2582 }
 0x32d   : > { %v2226_v9 = vadd.f32 %v5663_v46, %v2225_v17  ;;  %v3015_v41 = vpop.f32.mrb[38].mxu1  ;;  %3042 = vmatprep.mubr.msk.bf16.mxu0 %vm1761_vm4, %v2312_v30  ;;  %v2581_v30 = vpop.permute.xlu1 %2580 }
 0x32e   : > { %v2237_v4 = vadd.f32 %v3015_v41, %v5663_v46  ;;  %v2228_v7 = vpop.f32.mrb[39].mxu1  ;;  %3043 = vmatmul.mubr.msk.bf16.gmra.mrb[32].mxu0 %vm1761_vm4, %v2313_v24  ;;  %v2294_v21 = vmax.f32 %v2234_v6, 0.0 }
 0x32f   : > { %v2229_v48 = vadd.f32 %v5663_v46, %v2228_v7  ;;  %v2292_v34 = vmax.f32 %v2226_v9, 0.0 }
 0x330   : > { %v2295_v28 = vmax.f32 %v2237_v4, 0.0 }
 0x331   : > { %v2293_v43 = vmax.f32 %v2229_v48, 0.0  ;;  %v2585_v41 = vpop.permute.xlu1 %2584 }
 0x332   : > { %v2315_v2 = vpack.c.bf16 %v2295_v28, %v2294_v21 }
 0x333   : > { %v2314_v19 = vpack.c.bf16 %v2293_v43, %v2292_v34  ;;  %v3018_v36 = vpop.f32.mrb[40].mxu1  ;;  %v2587_v34 = vpop.permute.xlu0 %2586 }
 0x334   : > { %v2250_v47 = vadd.f32 %v3018_v36, %v5663_v46  ;;  %v2241_v49 = vpop.f32.mrb[41].mxu1 }
 0x335   : > { %v2242_v57 = vadd.f32 %v5663_v46, %v2241_v49  ;;  %v3019_v59 = vpop.f32.mrb[42].mxu1  ;;  %3046 = vmatprep.mubr.msk.bf16.mxu0 %vm1761_vm4, %v2314_v19 }
 0x336   : > { %v2253_v11 = vadd.f32 %v3019_v59, %v5663_v46  ;;  %v2244_v54 = vpop.f32.mrb[43].mxu1  ;;  %3047 = vmatmul.mubr.msk.bf16.gmra.mrb[36].mxu0 %vm1761_vm4, %v2315_v2  ;;  %v2298_v16 = vmax.f32 %v2250_v47, 0.0 }
 0x337   : > { %v2245_v14 = vadd.f32 %v5663_v46, %v2244_v54  ;;  %v2296_v33 = vmax.f32 %v2242_v57, 0.0  ;;  %v2591_v54 = vpop.permute.xlu0 %2590 }
 0x338   : > { %v2299_v35 = vmax.f32 %v2253_v11, 0.0  ;;  %v2589_v11 = vpop.permute.xlu1 %2588 }
 0x339   : > { %v2297_v45 = vmax.f32 %v2245_v14, 0.0 }
 0x33a   : > { %v2317_v50 = vpack.c.bf16 %v2299_v35, %v2298_v16 }
 0x33b   : > { %v2316_v31 = vpack.c.bf16 %v2297_v45, %v2296_v33  ;;  %v3022_v8 = vpop.f32.mrb[44].mxu1  ;;  %v2595_v16 = vpop.permute.xlu0 %2594 }
 0x33c   : > { %v2266_v55 = vadd.f32 %v3022_v8, %v5663_v46  ;;  %v2257_v58 = vpop.f32.mrb[45].mxu1  ;;  %v2593_v14 = vpop.permute.xlu1 %2592 }
 0x33d   : > { %3050 = vmatprep.mubr.msk.bf16.mxu0 %vm1761_vm4, %v2316_v31  ;;  %v2258_v20 = vadd.f32 %v5663_v46, %v2257_v58  ;;  %v3023_v26 = vpop.f32.mrb[46].mxu1 }
 0x33e   : > { %3051 = vmatmul.mubr.msk.bf16.gmra.mrb[40].mxu0 %vm1761_vm4, %v2317_v50  ;;  %v2269_v27 = vadd.f32 %v3023_v26, %v5663_v46  ;;  %v2260_v40 = vpop.f32.mrb[47].mxu1  ;;  %v2302_v29 = vmax.f32 %v2266_v55, 0.0 }
 0x33f   : > { %v2261_v39 = vadd.f32 %v5663_v46, %v2260_v40  ;;  %v2300_v44 = vmax.f32 %v2258_v20, 0.0  ;;  %v2599_v33 = vpop.permute.xlu0 %2598 }
 0x340   : > { %v2303_v23 = vmax.f32 %v2269_v27, 0.0  ;;  %v2597_v35 = vpop.permute.xlu1 %2596 }
 0x341   : > { %v2301_v3 = vmax.f32 %v2261_v39, 0.0 }
 0x342   : > { %v2319_v52 = vpack.c.bf16 %v2303_v23, %v2302_v29 }
 0x343   : > { %v2318_v25 = vpack.c.bf16 %v2301_v3, %v2300_v44  ;;  %v2603_v50 = vpop.permute.xlu0 %2602 }
 0x344   : > { %v2601_v45 = vpop.permute.xlu1 %2600 }
 0x345   : > { %3054 = vmatprep.mubr.msk.bf16.mxu0 %vm1761_vm4, %v2318_v25 }
 0x346   : > { %3055 = vmatmul.mubr.msk.bf16.gmra.mrb[44].mxu0 %vm1761_vm4, %v2319_v52 }
 0x347   : > { %v2607_v44 = vpop.permute.xlu0 %2606 }
 0x348   : > { %v2605_v26 = vpop.permute.xlu1 %2604 }
 0x381   : > { %v3028_v56 = vpop.f32.mrb[16].mxu0 }
 0x382   : > { %v2422_v46 = vadd.f32 %v3028_v56, %v5716_v18  ;;  %v2413_v12 = vpop.f32.mrb[17].mxu0 }
 0x383   : > { %v2414_v38 = vadd.f32 %v5716_v18, %v2413_v12  ;;  %v3029_v53 = vpop.f32.mrb[18].mxu0  ;;  %v2611_v12 = vpop.permute.xlu0 %2610 }
 0x384   : > { %v2670_v13 = vadd.f32 %v2577_v5, %v2422_v46  ;;  %v2425_v1 = vadd.f32 %v3029_v53, %v5716_v18  ;;  %v2416_v62 = vpop.f32.mrb[19].mxu0  ;;  %v2609_v46 = vpop.permute.xlu1 %2608 }
 0x385   : > { %v2668_v42 = vadd.f32 %v2573_v32, %v2414_v38  ;;  %v2417_v10 = vadd.f32 %v5716_v18, %v2416_v62 }
 0x386   : > { %v2702_v22 = vmax.f32 %v2670_v13, 0.0  ;;  %v2671_v37 = vadd.f32 %v2579_v63, %v2425_v1 }
 0x387   : > { %v2700_v61 = vmax.f32 %v2668_v42, 0.0  ;;  %v2669_v0 = vadd.f32 %v2575_v60, %v2417_v10 }
 0x388   : > { %2734 = vst.msk [vmem:[%s5725_s19 + $0x10] sm:$0xff] %vm1859_vm6, %v2702_v22  ;;  %v2703_v51 = vmax.f32 %v2671_v37, 0.0  ;;  %v2613_v10 = vpop.permute.xlu1 %2612 }
 0x389   : > { %2732 = vst.msk [vmem:[%s5725_s19] sm:$0xff] %vm1859_vm6, %v2700_v61  ;;  %v2701_v24 = vmax.f32 %v2669_v0, 0.0 }
 0x38a   : > { %2735 = vst.msk [vmem:[%s5725_s19 + $0x18] sm:$0xff] %vm1859_vm6, %v2703_v51  ;;  %v2615_v51 = vpop.permute.xlu0 %2614 }
 0x38b   : > { %2733 = vst.msk [vmem:[%s5725_s19 + $0x8] sm:$0xff] %vm1859_vm6, %v2701_v24 }
 0x3ba   : > { %v3032_v6 = vpop.f32.mrb[20].mxu0 }
 0x3bb   : > { %v2438_v17 = vadd.f32 %v3032_v6, %v5716_v18  ;;  %v2429_v9 = vpop.f32.mrb[21].mxu0 }
 0x3bc   : > { %v2430_v4 = vadd.f32 %v5716_v18, %v2429_v9  ;;  %v3033_v7 = vpop.f32.mrb[22].mxu0 }
 0x3bd   : > { %v2674_v48 = vadd.f32 %v2585_v41, %v2438_v17  ;;  %v2441_v21 = vadd.f32 %v3033_v7, %v5716_v18  ;;  %v2432_v28 = vpop.f32.mrb[23].mxu0 }
 0x3be   : > { %v2672_v43 = vadd.f32 %v2581_v30, %v2430_v4  ;;  %v2433_v2 = vadd.f32 %v5716_v18, %v2432_v28  ;;  %v2617_v4 = vpop.permute.xlu1 %2616 }
 0x3bf   : > { %v2706_v19 = vmax.f32 %v2674_v48, 0.0  ;;  %v2675_v36 = vadd.f32 %v2587_v34, %v2441_v21 }
 0x3c0   : > { %v2704_v47 = vmax.f32 %v2672_v43, 0.0  ;;  %v2673_v49 = vadd.f32 %v2583_v15, %v2433_v2  ;;  %v2619_v43 = vpop.permute.xlu0 %2618 }
 0x3c1   : > { %2738 = vst.msk [vmem:[%s5725_s19 + $0x30] sm:$0xff] %vm1859_vm6, %v2706_v19  ;;  %v2707_v57 = vmax.f32 %v2675_v36, 0.0 }
 0x3c2   : > { %2736 = vst.msk [vmem:[%s5725_s19 + $0x20] sm:$0xff] %vm1859_vm6, %v2704_v47  ;;  %v2705_v59 = vmax.f32 %v2673_v49, 0.0 }
 0x3c3   : > { %2739 = vst.msk [vmem:[%s5725_s19 + $0x38] sm:$0xff] %vm1859_vm6, %v2707_v57 }
 0x3c4   : > { %2737 = vst.msk [vmem:[%s5725_s19 + $0x28] sm:$0xff] %vm1859_vm6, %v2705_v59 }
 0x3eb   : > { %v3036_v31 = vpop.f32.mrb[24].mxu0 }
 0x3ec   : > { %v2454_v8 = vadd.f32 %v3036_v31, %v5716_v18  ;;  %v2445_v55 = vpop.f32.mrb[25].mxu0 }
 0x3ed   : > { %v2446_v58 = vadd.f32 %v5716_v18, %v2445_v55  ;;  %v3037_v20 = vpop.f32.mrb[26].mxu0 }
 0x3ee   : > { %v2678_v27 = vadd.f32 %v2593_v14, %v2454_v8  ;;  %v2457_v40 = vadd.f32 %v3037_v20, %v5716_v18  ;;  %v2448_v39 = vpop.f32.mrb[27].mxu0 }
 0x3ef   : > { %v2676_v29 = vadd.f32 %v2589_v11, %v2446_v58  ;;  %v2449_v23 = vadd.f32 %v5716_v18, %v2448_v39  ;;  %v2621_v11 = vpop.permute.xlu1 %2620 }
 0x3f0   : > { %v2710_v3 = vmax.f32 %v2678_v27, 0.0  ;;  %v2679_v52 = vadd.f32 %v2595_v16, %v2457_v40 }
 0x3f1   : > { %v2708_v25 = vmax.f32 %v2676_v29, 0.0  ;;  %v2677_v32 = vadd.f32 %v2591_v54, %v2449_v23 }
 0x3f2   : > { %2742 = vst.msk [vmem:[%s5725_s19 + $0x50] sm:$0xff] %vm1859_vm6, %v2710_v3  ;;  %v2711_v60 = vmax.f32 %v2679_v52, 0.0 }
 0x3f3   : > { %2740 = vst.msk [vmem:[%s5725_s19 + $0x40] sm:$0xff] %vm1859_vm6, %v2708_v25  ;;  %v2709_v56 = vmax.f32 %v2677_v32, 0.0  ;;  %v2625_v40 = vpop.permute.xlu1 %2624 }
 0x3f4   : > { %2743 = vst.msk [vmem:[%s5725_s19 + $0x58] sm:$0xff] %vm1859_vm6, %v2711_v60 }
 0x3f5   : > { %2741 = vst.msk [vmem:[%s5725_s19 + $0x48] sm:$0xff] %vm1859_vm6, %v2709_v56 }
 0x3f9   : > { %v3040_v5 = vpop.f32.mrb[28].mxu0 }
 0x3fa   : > { %v2470_v38 = vadd.f32 %v3040_v5, %v5716_v18  ;;  %v2461_v53 = vpop.f32.mrb[29].mxu0 }
 0x3fb   : > { %v2462_v13 = vadd.f32 %v5716_v18, %v2461_v53  ;;  %v3041_v1 = vpop.f32.mrb[30].mxu0 }
 0x3fc   : > { %v2682_v62 = vadd.f32 %v2601_v45, %v2470_v38  ;;  %v2473_v63 = vadd.f32 %v3041_v1, %v5716_v18  ;;  %v2464_v42 = vpop.f32.mrb[31].mxu0  ;;  %v2629_v38 = vpop.permute.xlu1 %2628 }
 0x3fd   : > { %v2680_v22 = vadd.f32 %v2597_v35, %v2462_v13  ;;  %v2465_v37 = vadd.f32 %v5716_v18, %v2464_v42 }
 0x3fe   : > { %v2714_v61 = vmax.f32 %v2682_v62, 0.0  ;;  %v2683_v0 = vadd.f32 %v2603_v50, %v2473_v63 }
 0x3ff   : > { %v2712_v24 = vmax.f32 %v2680_v22, 0.0  ;;  %v2681_v30 = vadd.f32 %v2599_v33, %v2465_v37  ;;  %v2623_v33 = vpop.permute.xlu0 %2622 }
 0x400   : > { %2746 = vst.msk [vmem:[%s5725_s19 + $0x70] sm:$0xff] %vm1859_vm6, %v2714_v61  ;;  %v2715_v15 = vmax.f32 %v2683_v0, 0.0 }
 0x401   : > { %2744 = vst.msk [vmem:[%s5725_s19 + $0x60] sm:$0xff] %vm1859_vm6, %v2712_v24  ;;  %v2713_v6 = vmax.f32 %v2681_v30, 0.0  ;;  %v3044_v17 = vpop.f32.mrb[32].mxu0  ;;  %v2633_v24 = vpop.permute.xlu1 %2632 }
 0x402   : > { %2747 = vst.msk [vmem:[%s5725_s19 + $0x78] sm:$0xff] %vm1859_vm6, %v2715_v15  ;;  %v2486_v9 = vadd.f32 %v3044_v17, %v5716_v18  ;;  %v2477_v41 = vpop.f32.mrb[33].mxu0 }
 0x403   : > { %2745 = vst.msk [vmem:[%s5725_s19 + $0x68] sm:$0xff] %vm1859_vm6, %v2713_v6  ;;  %v2478_v7 = vadd.f32 %v5716_v18, %v2477_v41  ;;  %v3045_v48 = vpop.f32.mrb[34].mxu0 }
 0x404   : > { %v2686_v21 = vadd.f32 %v2609_v46, %v2486_v9  ;;  %v2489_v28 = vadd.f32 %v3045_v48, %v5716_v18  ;;  %v2480_v34 = vpop.f32.mrb[35].mxu0 }
 0x405   : > { %v2684_v2 = vadd.f32 %v2605_v26, %v2478_v7  ;;  %v2481_v19 = vadd.f32 %v5716_v18, %v2480_v34 }
 0x406   : > { %v2718_v36 = vmax.f32 %v2686_v21, 0.0  ;;  %v2687_v47 = vadd.f32 %v2611_v12, %v2489_v28 }
 0x407   : > { %v2716_v49 = vmax.f32 %v2684_v2, 0.0  ;;  %v2685_v57 = vadd.f32 %v2607_v44, %v2481_v19  ;;  %v2627_v44 = vpop.permute.xlu0 %2626 }
 0x408   : > { %2750 = vst.msk [vmem:[%s5725_s19 + $0x90] sm:$0xff] %vm1859_vm6, %v2718_v36  ;;  %v2719_v59 = vmax.f32 %v2687_v47, 0.0 }
 0x409   : > { %2748 = vst.msk [vmem:[%s5725_s19 + $0x80] sm:$0xff] %vm1859_vm6, %v2716_v49  ;;  %v2717_v54 = vmax.f32 %v2685_v57, 0.0  ;;  %v3048_v14 = vpop.f32.mrb[36].mxu0 }
 0x40a   : > { %2751 = vst.msk [vmem:[%s5725_s19 + $0x98] sm:$0xff] %vm1859_vm6, %v2719_v59  ;;  %v2502_v16 = vadd.f32 %v3048_v14, %v5716_v18  ;;  %v2493_v35 = vpop.f32.mrb[37].mxu0 }
 0x40b   : > { %2749 = vst.msk [vmem:[%s5725_s19 + $0x88] sm:$0xff] %vm1859_vm6, %v2717_v54  ;;  %v2494_v45 = vadd.f32 %v5716_v18, %v2493_v35  ;;  %v3049_v50 = vpop.f32.mrb[38].mxu0  ;;  %v2631_v63 = vpop.permute.xlu0 %2630 }
 0x40c   : > { %v2690_v31 = vadd.f32 %v2617_v4, %v2502_v16  ;;  %v2505_v8 = vadd.f32 %v3049_v50, %v5716_v18  ;;  %v2496_v55 = vpop.f32.mrb[39].mxu0 }
 0x40d   : > { %v2688_v58 = vadd.f32 %v2613_v10, %v2494_v45  ;;  %v2497_v20 = vadd.f32 %v5716_v18, %v2496_v55 }
 0x40e   : > { %v2722_v26 = vmax.f32 %v2690_v31, 0.0  ;;  %v2691_v27 = vadd.f32 %v2619_v43, %v2505_v8 }
 0x40f   : > { %v2720_v39 = vmax.f32 %v2688_v58, 0.0  ;;  %v2689_v29 = vadd.f32 %v2615_v51, %v2497_v20  ;;  %v2635_v41 = vpop.permute.xlu0 %2634 }
 0x410   : > { %2754 = vst.msk [vmem:[%s5725_s19 + $0xb0] sm:$0xff] %vm1859_vm6, %v2722_v26  ;;  %v2723_v23 = vmax.f32 %v2691_v27, 0.0 }
 0x411   : > { %2752 = vst.msk [vmem:[%s5725_s19 + $0xa0] sm:$0xff] %vm1859_vm6, %v2720_v39  ;;  %v2721_v3 = vmax.f32 %v2689_v29, 0.0  ;;  %v3052_v52 = vpop.f32.mrb[40].mxu0 }
 0x412   : > { %2755 = vst.msk [vmem:[%s5725_s19 + $0xb8] sm:$0xff] %vm1859_vm6, %v2723_v23  ;;  %v2518_v25 = vadd.f32 %v3052_v52, %v5716_v18  ;;  %v2509_v32 = vpop.f32.mrb[41].mxu0 }
 0x413   : > { %2753 = vst.msk [vmem:[%s5725_s19 + $0xa8] sm:$0xff] %vm1859_vm6, %v2721_v3  ;;  %v2510_v60 = vadd.f32 %v5716_v18, %v2509_v32  ;;  %v3053_v56 = vpop.f32.mrb[42].mxu0 }
 0x414   : > { %v2694_v46 = vadd.f32 %v2625_v40, %v2518_v25  ;;  %v2521_v12 = vadd.f32 %v3053_v56, %v5716_v18  ;;  %v2512_v5 = vpop.f32.mrb[43].mxu0 }
 0x415   : > { %v2692_v53 = vadd.f32 %v2621_v11, %v2510_v60  ;;  %v2513_v13 = vadd.f32 %v5716_v18, %v2512_v5 }
 0x416   : > { %v2726_v1 = vmax.f32 %v2694_v46, 0.0  ;;  %v2695_v62 = vadd.f32 %v2627_v44, %v2521_v12 }
 0x417   : > { %v2724_v42 = vmax.f32 %v2692_v53, 0.0  ;;  %v2693_v10 = vadd.f32 %v2623_v33, %v2513_v13 }
 0x418   : > { %2758 = vst.msk [vmem:[%s5725_s19 + $0xd0] sm:$0xff] %vm1859_vm6, %v2726_v1  ;;  %v2727_v22 = vmax.f32 %v2695_v62, 0.0 }
 0x419   : > { %2756 = vst.msk [vmem:[%s5725_s19 + $0xc0] sm:$0xff] %vm1859_vm6, %v2724_v42  ;;  %v2725_v37 = vmax.f32 %v2693_v10, 0.0  ;;  %v3056_v61 = vpop.f32.mrb[44].mxu0 }
 0x41a   : > { %2759 = vst.msk [vmem:[%s5725_s19 + $0xd8] sm:$0xff] %vm1859_vm6, %v2727_v22  ;;  %v2534_v0 = vadd.f32 %v3056_v61, %v5716_v18  ;;  %v2525_v51 = vpop.f32.mrb[45].mxu0 }
 0x41b   : > { %2757 = vst.msk [vmem:[%s5725_s19 + $0xc8] sm:$0xff] %vm1859_vm6, %v2725_v37  ;;  %v2526_v30 = vadd.f32 %v5716_v18, %v2525_v51  ;;  %v3057_v15 = vpop.f32.mrb[46].mxu0 }
 0x41c   : > { %v2698_v6 = vadd.f32 %v2633_v24, %v2534_v0  ;;  %v2537_v17 = vadd.f32 %v3057_v15, %v5716_v18  ;;  %v2528_v9 = vpop.f32.mrb[47].mxu0 }
 0x41d   : > { %v2696_v4 = vadd.f32 %v2629_v38, %v2526_v30  ;;  %v2529_v7 = vadd.f32 %v5716_v18, %v2528_v9 }
 0x41e   : > { %v2730_v48 = vmax.f32 %v2698_v6, 0.0  ;;  %v2699_v21 = vadd.f32 %v2635_v41, %v2537_v17 }
 0x41f   : > { %v2728_v28 = vmax.f32 %v2696_v4, 0.0  ;;  %v2697_v34 = vadd.f32 %v2631_v63, %v2529_v7 }
 0x420   : > { %2762 = vst.msk [vmem:[%s5725_s19 + $0xf0] sm:$0xff] %vm1859_vm6, %v2730_v48  ;;  %v2731_v43 = vmax.f32 %v2699_v21, 0.0 }
 0x421   : > { %2760 = vst.msk [vmem:[%s5725_s19 + $0xe0] sm:$0xff] %vm1859_vm6, %v2728_v28  ;;  %v2729_v2 = vmax.f32 %v2697_v34, 0.0 }
 0x422   : > { %2763 = vst.msk [vmem:[%s5725_s19 + $0xf8] sm:$0xff] %vm1859_vm6, %v2731_v43 }
 0x423   : > { %2761 = vst.msk [vmem:[%s5725_s19 + $0xe8] sm:$0xff] %vm1859_vm6, %v2729_v2 }
 0x424 PF: > { %s18_s27 = sadd.s32 1, %s3736_s27  }
 0x425   : > { %p15_p4 = scmp.ge.s32.totalorder %s18_s27, 4  }
 0x427   :  { %17 = sbr.rel (!%p15_p4) target bundleno = 1 (0x1), region = 82 }

</bundles_post_ra>
